<compile_context>
chip_gen: v5e
topology: v5e:2x2
jax: 0.10.0
libtpu: 0.0.40
codegen_flags: <defaults>
</compile_context>

<pallas_src>
import jax
import jax.numpy as jnp
from jax.experimental import pallas as pl
from jax.experimental.pallas import tpu as pltpu

LANE = 128      # TPU lane width; all feature dims padded to a multiple of this
NB = 8          # images per grid step (sublane-aligned output block height)


def _round_up(n, m):
    return pl.cdiv(n, m) * m


def _pad_axis(x, target, axis):
    pad = target - x.shape[axis]
    if pad <= 0:
        return x
    widths = [(0, 0)] * x.ndim
    widths[axis] = (0, pad)
    return jnp.pad(x, widths)


def lll_net_kernel(patches_ref, pool_ref, wc_ref, bc_ref, w1_ref, b1_ref,
                   w2_ref, b2_ref, y_ref, feat_ref):
    """One grid step processes NB images.

    patches_ref : (NB*S, K_pad)   bf16 im2col patches for these NB images
    pool_ref    : (NB, NB*S)      f32 block-diagonal 0/1 sum-pool matrix (resident)
    wc_ref      : (K_pad, C_pad)  bf16 conv weight (transposed, zero-padded)
    bc_ref      : (1, C_pad)      f32 conv bias
    w1_ref      : (C_pad, F_pad)  bf16 backbone fc weight, pre-scaled by 1/S
    b1_ref      : (1, F_pad)      f32
    w2_ref      : (F_pad, O_pad)  bf16 LLL head weight
    b2_ref      : (1, O_pad)      f32
    y_ref       : (NB, O_pad)     f32 head logits
    feat_ref    : (NB, F_pad)     f32 features before the head (return_features)
    """
    # Conv2d as matmul over im2col patches (bf16 operands, f32 accumulate) + ReLU.
    h = jnp.dot(patches_ref[...], wc_ref[...], preferred_element_type=jnp.float32)
    h = jnp.maximum(h + bc_ref[...], 0.0)                          # (NB*S, C_pad)

    # Global average pool: per-image sum via block-diagonal ones matmul on the
    # MXU (no in-kernel reshape); the 1/S mean scale is folded into w1 on host.
    pooled = jnp.dot(pool_ref[...], h, preferred_element_type=jnp.float32)  # (NB, C_pad)

    # Backbone fc + ReLU -> features (what LLL_Net returns with return_features).
    f = jnp.dot(pooled.astype(jnp.bfloat16), w1_ref[...],
                preferred_element_type=jnp.float32)
    f = jnp.maximum(f + b1_ref[...], 0.0)
    feat_ref[...] = f

    # LLL head: nn.Linear(out_size, num_outputs).
    y = jnp.dot(f.astype(jnp.bfloat16), w2_ref[...],
                preferred_element_type=jnp.float32) + b2_ref[...]
    y_ref[...] = y


def im2col_3x3_pad1(x):
    """x: (N, C, H, W) NCHW -> (N*H*W, C*9) with (C, kh, kw) flattening order."""
    # TODO(synk): for v5e, move the 9-tap gather inside the kernel (NHWC tile +
    # shifted slices) to avoid the 9x im2col HBM round-trip.
    N, C, H, W = x.shape
    xp = jnp.pad(x, ((0, 0), (0, 0), (1, 1), (1, 1)))
    taps = []
    for kh in range(3):
        for kw in range(3):
            taps.append(xp[:, :, kh:kh + H, kw:kw + W])        # (N, C, H, W)
    p = jnp.stack(taps, axis=0)                                # (9, N, C, H, W)
    p = jnp.transpose(p, (1, 3, 4, 2, 0))                      # (N, H, W, C, 9)
    return p.reshape(N * H * W, C * 9)


def lll_net_forward(x, params):
    """Runs the fused Pallas forward. Returns (y, features)."""
    N, C, H, W = x.shape
    wc, bc = params["conv_w"], params["conv_b"]
    w1, b1 = params["fc_w"], params["fc_b"]
    w2, b2 = params["head_w"], params["head_b"]
    c_conv = wc.shape[0]
    out_size = w1.shape[0]
    num_out = w2.shape[0]
    S = H * W
    K = C * 9

    # Padded (lane-dense) sizes.
    K_pad = _round_up(K, LANE)
    C_pad = _round_up(c_conv, LANE)
    F_pad = _round_up(out_size, LANE)
    O_pad = _round_up(num_out, LANE)
    N_pad = _round_up(N, NB)
    rows_per_step = NB * S
    steps = N_pad // NB

    # im2col patches: zero-pad contraction dim and batch dim, cast to bf16.
    patches = im2col_3x3_pad1(x)                               # (N*S, K) f32
    patches = _pad_axis(patches, K_pad, axis=1)
    patches = _pad_axis(patches, N_pad * S, axis=0)
    patches = patches.astype(jnp.bfloat16)

    # Weights: transpose, zero-pad to lane-dense shapes, cast matmul operands
    # to bf16.  The 1/S mean scale is folded into w1 (kernel pools with a sum).
    wc_t = wc.reshape(c_conv, K).T                             # (K, c_conv)
    wc_t = _pad_axis(_pad_axis(wc_t, K_pad, 0), C_pad, 1).astype(jnp.bfloat16)
    bc_p = _pad_axis(bc.reshape(1, -1), C_pad, 1)              # f32
    w1_t = (w1.T / float(S))                                   # (c_conv, out_size)
    w1_t = _pad_axis(_pad_axis(w1_t, C_pad, 0), F_pad, 1).astype(jnp.bfloat16)
    b1_p = _pad_axis(b1.reshape(1, -1), F_pad, 1)
    w2_t = _pad_axis(_pad_axis(w2.T, F_pad, 0), O_pad, 1).astype(jnp.bfloat16)
    b2_p = _pad_axis(b2.reshape(1, -1), O_pad, 1)

    # Block-diagonal 0/1 sum-pooling matrix: pool[n, r] = 1 iff r // S == n.
    row_img = jnp.arange(rows_per_step) // S
    pool = (row_img[None, :] == jnp.arange(NB)[:, None]).astype(jnp.float32)

    resident = lambda i: (0, 0)
    in_specs = [
        pl.BlockSpec((rows_per_step, K_pad), lambda i: (i, 0)),   # patches
        pl.BlockSpec((NB, rows_per_step), resident),              # pool matrix
        pl.BlockSpec((K_pad, C_pad), resident),                   # conv weight
        pl.BlockSpec((1, C_pad), resident),                       # conv bias
        pl.BlockSpec((C_pad, F_pad), resident),                   # fc weight
        pl.BlockSpec((1, F_pad), resident),                       # fc bias
        pl.BlockSpec((F_pad, O_pad), resident),                   # head weight
        pl.BlockSpec((1, O_pad), resident),                       # head bias
    ]
    out_specs = (
        pl.BlockSpec((NB, O_pad), lambda i: (i, 0)),              # logits
        pl.BlockSpec((NB, F_pad), lambda i: (i, 0)),              # features
    )

    flops = steps * (2 * rows_per_step * K_pad * C_pad       # conv matmul
                     + 2 * NB * rows_per_step * C_pad        # pool matmul
                     + 2 * NB * C_pad * F_pad                # backbone fc
                     + 2 * NB * F_pad * O_pad)               # head
    bytes_accessed = (patches.size * 2 + pool.size * 4
                      + (wc_t.size + w1_t.size + w2_t.size) * 2
                      + (bc_p.size + b1_p.size + b2_p.size) * 4
                      + (N_pad * O_pad + N_pad * F_pad) * 4)
    cost = pl.CostEstimate(flops=flops, transcendentals=0,
                           bytes_accessed=bytes_accessed)

    y_p, feat_p = pl.pallas_call(
        lll_net_kernel,
        out_shape=(jax.ShapeDtypeStruct((N_pad, O_pad), jnp.float32),
                   jax.ShapeDtypeStruct((N_pad, F_pad), jnp.float32)),
        grid=(steps,),
        in_specs=in_specs,
        out_specs=out_specs,
        compiler_params=pltpu.CompilerParams(
            dimension_semantics=("parallel",),        # shard batch across TCs (v7x)
            vmem_limit_bytes=32 * 1024 * 1024),
        cost_estimate=cost,
    )(patches, pool, wc_t, bc_p, w1_t, b1_p, w2_t, b2_p)

    return y_p[:N, :num_out], feat_p[:N, :out_size]


def init_params(key, c_in=4, c_conv=8, out_size=32, num_outputs=10):
    """Deterministic synthetic parameters (shapes implied by the module)."""
    k = jax.random.split(key, 6)
    return {
        "conv_w": 0.1 * jax.random.normal(k[0], (c_conv, c_in, 3, 3), jnp.float32),
        "conv_b": 0.1 * jax.random.normal(k[1], (c_conv,), jnp.float32),
        "fc_w":   0.1 * jax.random.normal(k[2], (out_size, c_conv), jnp.float32),
        "fc_b":   0.1 * jax.random.normal(k[3], (out_size,), jnp.float32),
        # LLL_Net.modify_head(num_outputs) -> nn.Linear(out_size, num_outputs)
        "head_w": 0.1 * jax.random.normal(k[4], (num_outputs, out_size), jnp.float32),
        "head_b": 0.1 * jax.random.normal(k[5], (num_outputs,), jnp.float32),
    }


def reference_forward(x, params):
    """Pure-JAX f32 reference for a sanity check."""
    wc, bc = params["conv_w"], params["conv_b"]
    w1, b1 = params["fc_w"], params["fc_b"]
    w2, b2 = params["head_w"], params["head_b"]
    N, C, H, W = x.shape
    patches = im2col_3x3_pad1(x)
    h = jnp.maximum(patches @ wc.reshape(wc.shape[0], -1).T + bc, 0.0)
    pooled = jnp.mean(h.reshape(N, H * W, -1), axis=1)
    f = jnp.maximum(pooled @ w1.T + b1, 0.0)
    return f @ w2.T + b2, f


if __name__ == "__main__":
    key = jax.random.PRNGKey(0)
    kx, kp = jax.random.split(key)
    x = jax.random.normal(kx, (2, 4, 16, 16), jnp.float32)      # NCHW like PyTorch
    params = init_params(kp, c_in=4, c_conv=8, out_size=32, num_outputs=10)

    y, feat = jax.jit(lll_net_forward)(x, params)
    jax.block_until_ready((y, feat))

    y_ref, feat_ref = reference_forward(x, params)
    # bf16 matmul operands (f32 accumulate) -> loosened tolerances.
    assert jnp.allclose(y, y_ref, atol=2e-2, rtol=2e-2), (
        f"logits max diff {jnp.max(jnp.abs(y - y_ref))}")
    assert jnp.allclose(feat, feat_ref, atol=2e-2, rtol=2e-2), (
        f"features max diff {jnp.max(jnp.abs(feat - feat_ref))}")

    print("KERNEL_OK")
</pallas_src>

<mosaic_0001>
module attributes {stable_mosaic.version = 11 : i64} {
  func.func @lll_net_kernel(%arg0: i32, %arg1: memref<2048x128xbf16, #tpu.memory_space<vmem>>, %arg2: memref<8x2048xf32, #tpu.memory_space<vmem>>, %arg3: memref<128x128xbf16, #tpu.memory_space<vmem>>, %arg4: memref<1x128xf32, #tpu.memory_space<vmem>>, %arg5: memref<128x128xbf16, #tpu.memory_space<vmem>>, %arg6: memref<1x128xf32, #tpu.memory_space<vmem>>, %arg7: memref<128x128xbf16, #tpu.memory_space<vmem>>, %arg8: memref<1x128xf32, #tpu.memory_space<vmem>>, %arg9: memref<8x128xf32, #tpu.memory_space<vmem>>, %arg10: memref<8x128xf32, #tpu.memory_space<vmem>>) attributes {dimension_semantics = [#tpu.dimension_semantics<parallel>], iteration_bounds = array<i64: 1>, scalar_prefetch = 0 : i64, scratch_operands = 0 : i64, tpu.core_type = #tpu.core_type<tc>, window_params = [{transform_indices = @transform_0, window_bounds = array<i64: 2048, 128>}, {pipeline_mode = #tpu.pipeline_mode<synchronous>, transform_indices = @transform_1, window_bounds = array<i64: 8, 2048>}, {pipeline_mode = #tpu.pipeline_mode<synchronous>, transform_indices = @transform_2, window_bounds = array<i64: 128, 128>}, {pipeline_mode = #tpu.pipeline_mode<synchronous>, transform_indices = @transform_3, window_bounds = array<i64: 1, 128>}, {pipeline_mode = #tpu.pipeline_mode<synchronous>, transform_indices = @transform_4, window_bounds = array<i64: 128, 128>}, {pipeline_mode = #tpu.pipeline_mode<synchronous>, transform_indices = @transform_5, window_bounds = array<i64: 1, 128>}, {pipeline_mode = #tpu.pipeline_mode<synchronous>, transform_indices = @transform_6, window_bounds = array<i64: 128, 128>}, {pipeline_mode = #tpu.pipeline_mode<synchronous>, transform_indices = @transform_7, window_bounds = array<i64: 1, 128>}, {transform_indices = @transform_8, window_bounds = array<i64: 8, 128>}, {transform_indices = @transform_9, window_bounds = array<i64: 8, 128>}]} {
    %c0 = arith.constant 0 : index
    %c0_0 = arith.constant 0 : index
    %0 = vector.load %arg1[%c0, %c0_0] : memref<2048x128xbf16, #tpu.memory_space<vmem>>, vector<2048x128xbf16>
    %c0_1 = arith.constant 0 : index
    %c0_2 = arith.constant 0 : index
    %1 = vector.load %arg3[%c0_1, %c0_2] : memref<128x128xbf16, #tpu.memory_space<vmem>>, vector<128x128xbf16>
    %cst = arith.constant dense<0.000000e+00> : vector<2048x128xf32>
    %2 = tpu.matmul %0, %1, %cst {dimension_numbers = #tpu.dot_dimension_numbers<[1], [0], [0], [1], [0, 0, 1, 1], [], []>} : vector<2048x128xbf16>, vector<128x128xbf16>, vector<2048x128xf32> -> vector<2048x128xf32>
    %c0_3 = arith.constant 0 : index
    %c0_4 = arith.constant 0 : index
    %3 = vector.load %arg4[%c0_3, %c0_4] : memref<1x128xf32, #tpu.memory_space<vmem>>, vector<1x128xf32>
    %4 = vector.broadcast %3 : vector<1x128xf32> to vector<2048x128xf32>
    %5 = arith.addf %2, %4 : vector<2048x128xf32>
    %cst_5 = arith.constant 0.000000e+00 : f32
    %6 = vector.broadcast %cst_5 : f32 to vector<2048x128xf32>
    %7 = arith.maximumf %5, %6 : vector<2048x128xf32>
    %c0_6 = arith.constant 0 : index
    %c0_7 = arith.constant 0 : index
    %8 = vector.load %arg2[%c0_6, %c0_7] : memref<8x2048xf32, #tpu.memory_space<vmem>>, vector<8x2048xf32>
    %cst_8 = arith.constant dense<0.000000e+00> : vector<8x128xf32>
    %9 = tpu.matmul %8, %7, %cst_8 {dimension_numbers = #tpu.dot_dimension_numbers<[1], [0], [0], [1], [0, 0, 1, 1], [], []>} : vector<8x2048xf32>, vector<2048x128xf32>, vector<8x128xf32> -> vector<8x128xf32>
    %10 = arith.truncf %9 : vector<8x128xf32> to vector<8x128xbf16>
    %c0_9 = arith.constant 0 : index
    %c0_10 = arith.constant 0 : index
    %11 = vector.load %arg5[%c0_9, %c0_10] : memref<128x128xbf16, #tpu.memory_space<vmem>>, vector<128x128xbf16>
    %cst_11 = arith.constant dense<0.000000e+00> : vector<8x128xf32>
    %12 = tpu.matmul %10, %11, %cst_11 {dimension_numbers = #tpu.dot_dimension_numbers<[1], [0], [0], [1], [0, 0, 1, 1], [], []>} : vector<8x128xbf16>, vector<128x128xbf16>, vector<8x128xf32> -> vector<8x128xf32>
    %c0_12 = arith.constant 0 : index
    %c0_13 = arith.constant 0 : index
    %13 = vector.load %arg6[%c0_12, %c0_13] : memref<1x128xf32, #tpu.memory_space<vmem>>, vector<1x128xf32>
    %14 = vector.broadcast %13 : vector<1x128xf32> to vector<8x128xf32>
    %15 = arith.addf %12, %14 : vector<8x128xf32>
    %cst_14 = arith.constant 0.000000e+00 : f32
    %16 = vector.broadcast %cst_14 : f32 to vector<8x128xf32>
    %17 = arith.maximumf %15, %16 : vector<8x128xf32>
    %c0_15 = arith.constant 0 : index
    %c0_16 = arith.constant 0 : index
    %18 = vector.load %arg10[%c0_15, %c0_16] : memref<8x128xf32, #tpu.memory_space<vmem>>, vector<8x128xf32>
    tpu.vector_store %arg10[%c0_15, %c0_16], %17 {strides = array<i32>} : memref<8x128xf32, #tpu.memory_space<vmem>>, vector<8x128xf32>,
    %19 = arith.truncf %17 : vector<8x128xf32> to vector<8x128xbf16>
    %c0_17 = arith.constant 0 : index
    %c0_18 = arith.constant 0 : index
    %20 = vector.load %arg7[%c0_17, %c0_18] : memref<128x128xbf16, #tpu.memory_space<vmem>>, vector<128x128xbf16>
    %cst_19 = arith.constant dense<0.000000e+00> : vector<8x128xf32>
    %21 = tpu.matmul %19, %20, %cst_19 {dimension_numbers = #tpu.dot_dimension_numbers<[1], [0], [0], [1], [0, 0, 1, 1], [], []>} : vector<8x128xbf16>, vector<128x128xbf16>, vector<8x128xf32> -> vector<8x128xf32>
    %c0_20 = arith.constant 0 : index
    %c0_21 = arith.constant 0 : index
    %22 = vector.load %arg8[%c0_20, %c0_21] : memref<1x128xf32, #tpu.memory_space<vmem>>, vector<1x128xf32>
    %23 = vector.broadcast %22 : vector<1x128xf32> to vector<8x128xf32>
    %24 = arith.addf %21, %23 : vector<8x128xf32>
    %c0_22 = arith.constant 0 : index
    %c0_23 = arith.constant 0 : index
    %25 = vector.load %arg9[%c0_22, %c0_23] : memref<8x128xf32, #tpu.memory_space<vmem>>, vector<8x128xf32>
    tpu.vector_store %arg9[%c0_22, %c0_23], %24 {strides = array<i32>} : memref<8x128xf32, #tpu.memory_space<vmem>>, vector<8x128xf32>,
    return
  }
  func.func @transform_0(%arg0: i32) -> (i32, i32) {
    %c0_i32 = arith.constant 0 : i32
    %c0_i32_0 = arith.constant 0 : i32
    return %arg0, %c0_i32 : i32, i32
  }
  func.func @transform_1(%arg0: i32) -> (i32, i32) {
    %c0_i32 = arith.constant 0 : i32
    %c0_i32_0 = arith.constant 0 : i32
    %c0_i32_1 = arith.constant 0 : i32
    return %c0_i32, %c0_i32_0 : i32, i32
  }
  func.func @transform_2(%arg0: i32) -> (i32, i32) {
    %c0_i32 = arith.constant 0 : i32
    %c0_i32_0 = arith.constant 0 : i32
    %c0_i32_1 = arith.constant 0 : i32
    return %c0_i32, %c0_i32_0 : i32, i32
  }
  func.func @transform_3(%arg0: i32) -> (i32, i32) {
    %c0_i32 = arith.constant 0 : i32
    %c0_i32_0 = arith.constant 0 : i32
    %c0_i32_1 = arith.constant 0 : i32
    return %c0_i32, %c0_i32_0 : i32, i32
  }
  func.func @transform_4(%arg0: i32) -> (i32, i32) {
    %c0_i32 = arith.constant 0 : i32
    %c0_i32_0 = arith.constant 0 : i32
    %c0_i32_1 = arith.constant 0 : i32
    return %c0_i32, %c0_i32_0 : i32, i32
  }
  func.func @transform_5(%arg0: i32) -> (i32, i32) {
    %c0_i32 = arith.constant 0 : i32
    %c0_i32_0 = arith.constant 0 : i32
    %c0_i32_1 = arith.constant 0 : i32
    return %c0_i32, %c0_i32_0 : i32, i32
  }
  func.func @transform_6(%arg0: i32) -> (i32, i32) {
    %c0_i32 = arith.constant 0 : i32
    %c0_i32_0 = arith.constant 0 : i32
    %c0_i32_1 = arith.constant 0 : i32
    return %c0_i32, %c0_i32_0 : i32, i32
  }
  func.func @transform_7(%arg0: i32) -> (i32, i32) {
    %c0_i32 = arith.constant 0 : i32
    %c0_i32_0 = arith.constant 0 : i32
    %c0_i32_1 = arith.constant 0 : i32
    return %c0_i32, %c0_i32_0 : i32, i32
  }
  func.func @transform_8(%arg0: i32) -> (i32, i32) {
    %c0_i32 = arith.constant 0 : i32
    %c0_i32_0 = arith.constant 0 : i32
    return %arg0, %c0_i32 : i32, i32
  }
  func.func @transform_9(%arg0: i32) -> (i32, i32) {
    %c0_i32 = arith.constant 0 : i32
    %c0_i32_0 = arith.constant 0 : i32
    return %arg0, %c0_i32 : i32, i32
  }
}

</mosaic_0001>

<bundles_post_ra>
// kernel: lll_net_forward.1
= control target key start
LH: loop header
LB: loop body
LE: loop exit
PB: predicated region body
PF: predicated region fallthrough
CT: control target
= control target key end

     0   :  { %s4813_s2 = inlined_call_operand.vmem [shape: bf16[128,128], index: 2, kind: input, shape index: {}]   ;;  %s4814_s3 = inlined_call_operand.vmem [shape: f32[1,128], index: 3, kind: input, shape index: {}]   ;;  %s4815_s0 = inlined_call_operand.vmem [shape: bf16[2048,128], index: 0, kind: input, shape index: {}]   ;;  %s4816_s1 = inlined_call_operand.vmem [shape: f32[8,2048], index: 1, kind: input, shape index: {}]   ;;  %s4817_s4 = inlined_call_operand.vmem [shape: bf16[128,128], index: 4, kind: input, shape index: {}]   ;;  %s4818_s5 = inlined_call_operand.vmem [shape: f32[1,128], index: 5, kind: input, shape index: {}]   ;;  %s4819_s6 = inlined_call_operand.vmem [shape: bf16[128,128], index: 6, kind: input, shape index: {}]   ;;  %s4820_s7 = inlined_call_operand.vmem [shape: f32[1,128], index: 7, kind: input, shape index: {}]   ;;  %s4821_s9 = inlined_call_operand.vmem [shape: f32[8,128], index: 9, kind: output, shape index: {1}]   ;;  %s4822_s8 = inlined_call_operand.vmem [shape: f32[8,128], index: 8, kind: output, shape index: {0}]  }
   0x1   :  { %v3282_v0 = vld [vmem:[%s4813_s2 + $0x38] sm:$0xff]  ;;  %v3281_v1 = vld [vmem:[%s4813_s2 + $0x30] sm:$0xff]  ;;  %v3280_v2 = vld [vmem:[%s4813_s2 + $0x28] sm:$0xff] }
   0x2   :  { %1123 = vmatpush.bf16.msra.mxu0 %v3282_v0  ;;  %3299 = vmatpush.bf16.msra.mxu1 %v3282_v0  ;;  %v3279_v3 = vld [vmem:[%s4813_s2 + $0x20] sm:$0xff]  ;;  %v3278_v4 = vld [vmem:[%s4813_s2 + $0x18] sm:$0xff]  ;;  %v3277_v5 = vld [vmem:[%s4813_s2 + $0x10] sm:$0xff] }
   0x3   :  { %3300 = vmatpush.bf16.msra.mxu2 %v3282_v0  ;;  %3301 = vmatpush.bf16.msra.mxu3 %v3282_v0  ;;  %v3276_v6 = vld [vmem:[%s4813_s2 + $0x8] sm:$0xff]  ;;  %v3275_v7 = vld [vmem:[%s4813_s2] sm:$0xff]  ;;  %v3149_v10 = vld [vmem:[%s4815_s0 + $0x10] sm:$0xff] }
   0x4   :  { %v3147_v8 = vld [vmem:[%s4815_s0] sm:$0xff]  ;;  %v3148_v9 = vld [vmem:[%s4815_s0 + $0x8] sm:$0xff]  ;;  %v3150_v11 = vld [vmem:[%s4815_s0 + $0x18] sm:$0xff] }
   0x5   :  { %v3151_v12 = vld [vmem:[%s4815_s0 + $0x20] sm:$0xff]  ;;  %v3152_v13 = vld [vmem:[%s4815_s0 + $0x28] sm:$0xff]  ;;  %v3153_v14 = vld [vmem:[%s4815_s0 + $0x30] sm:$0xff] }
   0x6   :  { %1124 = vmatpush.bf16.msra.mxu0 %v3281_v1  ;;  %3302 = vmatpush.bf16.msra.mxu1 %v3281_v1  ;;  %v3218_v15 = vld [vmem:[%s4815_s0 + $0x238] sm:$0xff]  ;;  %v3219_v17 = vld [vmem:[%s4815_s0 + $0x240] sm:$0xff]  ;;  %v3220_v20 = vld [vmem:[%s4815_s0 + $0x248] sm:$0xff] }
   0x7   :  { %3303 = vmatpush.bf16.msra.mxu2 %v3281_v1  ;;  %3304 = vmatpush.bf16.msra.mxu3 %v3281_v1  ;;  %v3154_v16 = vld [vmem:[%s4815_s0 + $0x38] sm:$0xff]  ;;  %v3155_v18 = vld [vmem:[%s4815_s0 + $0x40] sm:$0xff]  ;;  %v3156_v22 = vld [vmem:[%s4815_s0 + $0x48] sm:$0xff] }
   0x8   :  { %v3221_v24 = vld [vmem:[%s4815_s0 + $0x250] sm:$0xff]  ;;  %v3188_v26 = vld [vmem:[%s4815_s0 + $0x148] sm:$0xff]  ;;  %v3222_v29 = vld [vmem:[%s4815_s0 + $0x258] sm:$0xff] }
   0x9   :  { %v3157_v27 = vld [vmem:[%s4815_s0 + $0x50] sm:$0xff]  ;;  %v3248_v30 = vld [vmem:[%s4815_s0 + $0x328] sm:$0xff]  ;;  %v3158_v33 = vld [vmem:[%s4815_s0 + $0x58] sm:$0xff] }
   0xa   :  { %1125 = vmatpush.bf16.msra.mxu0 %v3280_v2  ;;  %3305 = vmatpush.bf16.msra.mxu1 %v3280_v2  ;;  %v3189_v32 = vld [vmem:[%s4815_s0 + $0x150] sm:$0xff]  ;;  %v3223_v35 = vld [vmem:[%s4815_s0 + $0x260] sm:$0xff]  ;;  %v3190_v38 = vld [vmem:[%s4815_s0 + $0x158] sm:$0xff] }
   0xb   :  { %3306 = vmatpush.bf16.msra.mxu2 %v3280_v2  ;;  %3307 = vmatpush.bf16.msra.mxu3 %v3280_v2  ;;  %v3249_v36 = vld [vmem:[%s4815_s0 + $0x330] sm:$0xff]  ;;  %v3159_v39 = vld [vmem:[%s4815_s0 + $0x60] sm:$0xff]  ;;  %v3224_v41 = vld [vmem:[%s4815_s0 + $0x268] sm:$0xff] }
   0xc   :  { %v3250_v42 = vld [vmem:[%s4815_s0 + $0x338] sm:$0xff]  ;;  %v3191_v44 = vld [vmem:[%s4815_s0 + $0x160] sm:$0xff]  ;;  %v3160_v45 = vld [vmem:[%s4815_s0 + $0x68] sm:$0xff] }
   0xd   :  { %v3225_v47 = vld [vmem:[%s4815_s0 + $0x270] sm:$0xff]  ;;  %v3251_v48 = vld [vmem:[%s4815_s0 + $0x340] sm:$0xff]  ;;  %v3192_v50 = vld [vmem:[%s4815_s0 + $0x168] sm:$0xff] }
   0xe   :  { %1126 = vmatpush.bf16.msra.mxu0 %v3279_v3  ;;  %3308 = vmatpush.bf16.msra.mxu1 %v3279_v3  ;;  %v3161_v51 = vld [vmem:[%s4815_s0 + $0x70] sm:$0xff]  ;;  %v3226_v53 = vld [vmem:[%s4815_s0 + $0x278] sm:$0xff]  ;;  %v3252_v54 = vld [vmem:[%s4815_s0 + $0x348] sm:$0xff] }
   0xf   :  { %3309 = vmatpush.bf16.msra.mxu2 %v3279_v3  ;;  %3310 = vmatpush.bf16.msra.mxu3 %v3279_v3  ;;  %v3193_v56 = vld [vmem:[%s4815_s0 + $0x170] sm:$0xff]  ;;  %v3162_v58 = vld [vmem:[%s4815_s0 + $0x78] sm:$0xff]  ;;  %v3227_v61 = vld [vmem:[%s4815_s0 + $0x280] sm:$0xff] }
  0x10   :  { %v3538_v62 = vld [vmem:[%s4814_s3] ss:$0 sm:$0xff]  ;;  %v3253_v63 = vld [vmem:[%s4815_s0 + $0x350] sm:$0xff]  ;;  %v3194_v1 = vld [vmem:[%s4815_s0 + $0x178] sm:$0xff] }
  0x12   :  { %1127 = vmatpush.bf16.msra.mxu0 %v3278_v4  ;;  %3311 = vmatpush.bf16.msra.mxu1 %v3278_v4 }
  0x13   :  { %3312 = vmatpush.bf16.msra.mxu2 %v3278_v4  ;;  %3313 = vmatpush.bf16.msra.mxu3 %v3278_v4 }
  0x16   :  { %1128 = vmatpush.bf16.msra.mxu0 %v3277_v5  ;;  %3314 = vmatpush.bf16.msra.mxu1 %v3277_v5 }
  0x17   :  { %3315 = vmatpush.bf16.msra.mxu2 %v3277_v5  ;;  %3316 = vmatpush.bf16.msra.mxu3 %v3277_v5 }
  0x1a   :  { %1129 = vmatpush.bf16.msra.mxu0 %v3276_v6  ;;  %3317 = vmatpush.bf16.msra.mxu1 %v3276_v6 }
  0x1b   :  { %3318 = vmatpush.bf16.msra.mxu2 %v3276_v6  ;;  %3319 = vmatpush.bf16.msra.mxu3 %v3276_v6 }
  0x1e   :  { %1130 = vmatpush.bf16.msra.mxu0 %v3275_v7  ;;  %3320 = vmatpush.bf16.msra.mxu1 %v3275_v7 }
  0x1f   :  { %3321 = vmatpush.bf16.msra.mxu2 %v3275_v7  ;;  %3322 = vmatpush.bf16.msra.mxu3 %v3275_v7 }
  0x21   :  { %1131 = vmatmul.bf16.vlgmr.msra.gmra.mxu0 %v3147_v8  ;;  %1336 = vmatmul.bf16.vlgmr.msra.gmra.mxu1 %v3188_v26 }
  0x22   :  { %1486 = vmatmul.bf16.vlgmr.msra.gmra.mxu2 %v3218_v15  ;;  %1636 = vmatmul.bf16.vlgmr.msra.gmra.mxu3 %v3248_v30  ;;  %v3195_v30 = vld [vmem:[%s4815_s0 + $0x180] sm:$0xff] }
  0x31   :  { %1136 = vmatmul.bf16.gmra.mxu0 %v3148_v9  ;;  %1341 = vmatmul.bf16.gmra.mxu1 %v3189_v32 }
  0x32   :  { %1491 = vmatmul.bf16.gmra.mxu2 %v3219_v17  ;;  %1641 = vmatmul.bf16.gmra.mxu3 %v3249_v36 }
  0x41   :  { %1141 = vmatmul.bf16.gmra.mxu0 %v3149_v10  ;;  %1346 = vmatmul.bf16.gmra.mxu1 %v3190_v38 }
  0x42   :  { %1496 = vmatmul.bf16.gmra.mxu2 %v3220_v20  ;;  %1646 = vmatmul.bf16.gmra.mxu3 %v3250_v42 }
  0x51   :  { %1146 = vmatmul.bf16.gmra.mxu0 %v3150_v11  ;;  %1351 = vmatmul.bf16.gmra.mxu1 %v3191_v44  ;;  %v3163_v11 = vld [vmem:[%s4815_s0 + $0x80] sm:$0xff] }
  0x52   :  { %1501 = vmatmul.bf16.gmra.mxu2 %v3221_v24  ;;  %1651 = vmatmul.bf16.gmra.mxu3 %v3251_v48 }
  0x61   :  { %1151 = vmatmul.bf16.gmra.mxu0 %v3151_v12  ;;  %1356 = vmatmul.bf16.gmra.mxu1 %v3192_v50  ;;  %v3196_v50 = vld [vmem:[%s4815_s0 + $0x188] sm:$0xff] }
  0x62   :  { %1506 = vmatmul.bf16.gmra.mxu2 %v3222_v29  ;;  %1656 = vmatmul.bf16.gmra.mxu3 %v3252_v54 }
  0x71   :  { %1156 = vmatmul.bf16.gmra.mxu0 %v3152_v13  ;;  %1361 = vmatmul.bf16.gmra.mxu1 %v3193_v56  ;;  %v3230_v56 = vld [vmem:[%s4815_s0 + $0x298] sm:$0xff] }
  0x72   :  { %1511 = vmatmul.bf16.gmra.mxu2 %v3223_v35  ;;  %1661 = vmatmul.bf16.gmra.mxu3 %v3253_v63  ;;  %v3197_v63 = vld [vmem:[%s4815_s0 + $0x190] sm:$0xff] }
  0x81   :  { %1161 = vmatmul.bf16.gmra.mxu0 %v3153_v14  ;;  %1366 = vmatmul.bf16.gmra.mxu1 %v3194_v1 }
  0x82   :  { %1516 = vmatmul.bf16.gmra.mxu2 %v3224_v41  ;;  %v3164_v41 = vld [vmem:[%s4815_s0 + $0x88] sm:$0xff] }
  0x91   :  { %1166 = vmatmul.bf16.gmra.mxu0 %v3154_v16  ;;  %1371 = vmatmul.bf16.gmra.mxu1 %v3195_v30  ;;  %v3258_v30 = vld [vmem:[%s4815_s0 + $0x378] sm:$0xff] }
  0x92   :  { %1521 = vmatmul.bf16.gmra.mxu2 %v3225_v47 }
  0x9e   :  { %v3435_v19 = vpop.f32.mrf.mxu0  ;;  %v3603_v48 = vpop.f32.mrf.mxu1 }
  0xa1   :  { %1171 = vmatmul.bf16.gmra.mxu0 %v3155_v18  ;;  %v3228_v18 = vld [vmem:[%s4815_s0 + $0x288] sm:$0xff]  ;;  %1376 = vmatmul.bf16.gmra.mxu1 %v3196_v50 }
  0xa2   :  { %1526 = vmatmul.bf16.gmra.mxu2 %v3226_v53 }
  0xa5   :  { %v3525_v57 = vpop.f32.mrf.mxu2  ;;  %v3639_v1 = vpop.f32.mrf.mxu3 }
  0xa6   :  { %v3440_v21 = vpop.f32.mrf.mxu0  ;;  %4823 = vst [vmem:[#allocation2_spill] sm:$0xff] %v3525_v57  ;;  %v3618_v53 = vpop.f32.mrf.mxu1 }
  0xa7   :  { %4832 = vst [vmem:[#allocation11_spill] sm:$0xff] %v3639_v1 }
  0xad   :  { %v3530_v60 = vpop.f32.mrf.mxu2 }
  0xae   :  { %v3445_v23 = vpop.f32.mrf.mxu0  ;;  %4824 = vst [vmem:[#allocation3_spill] sm:$0xff] %v3530_v60 }
  0xb1   :  { %1176 = vmatmul.bf16.gmra.mxu0 %v3156_v22  ;;  %1381 = vmatmul.bf16.gmra.mxu1 %v3197_v63  ;;  %v3260_v63 = vld [vmem:[%s4815_s0 + $0x388] sm:$0xff] }
  0xb2   :  { %1531 = vmatmul.bf16.gmra.mxu2 %v3227_v61 }
  0xb5   :  { %v3548_v4 = vpop.f32.mrf.mxu2 }
  0xb6   :  { %v3450_v25 = vpop.f32.mrf.mxu0  ;;  %4825 = vst [vmem:[#allocation4_spill] sm:$0xff] %v3548_v4 }
  0xbd   :  { %v3559_v15 = vpop.f32.mrf.mxu2 }
  0xbe   :  { %v3458_v28 = vpop.f32.mrf.mxu0  ;;  %4826 = vst [vmem:[#allocation5_spill] sm:$0xff] %v3559_v15 }
  0xbf   :  { %v1143_v38 = vadd.f32 %v3538_v62, %v3458_v28  ;;  %v1135_v28 = vadd.f32 %v3538_v62, %v3440_v21  ;;  %v3255_v21 = vld [vmem:[%s4815_s0 + $0x360] sm:$0xff] }
  0xc1   :  { %1181 = vmatmul.bf16.gmra.mxu0 %v3157_v27  ;;  %v3254_v27 = vld [vmem:[%s4815_s0 + $0x358] sm:$0xff] }
  0xc2   :  { %1536 = vmatmul.bf16.gmra.mxu2 %v3228_v18  ;;  %1666 = vmatmul.bf16.gmra.mxu3 %v3254_v27 }
  0xc5   :  { %v3579_v35 = vpop.f32.mrf.mxu2 }
  0xc6   :  { %v3466_v31 = vpop.f32.mrf.mxu0  ;;  %4827 = vst [vmem:[#allocation6_spill] sm:$0xff] %v3579_v35 }
  0xc7   :  { %v1145_v36 = vadd.f32 %v3538_v62, %v3466_v31  ;;  %v1138_v31 = vadd.f32 %v3538_v62, %v3445_v23  ;;  %v1773_v23 = vmax.f32 %v1135_v28, 0.0  ;;  %v3259_v28 = vld [vmem:[%s4815_s0 + $0x380] sm:$0xff] }
  0xc9   :  { %v1774_v47 = vmax.f32 %v1138_v31, 0.0  ;;  %v3233_v31 = vld [vmem:[%s4815_s0 + $0x2b0] sm:$0xff] }
  0xcd   :  { %v3594_v44 = vpop.f32.mrf.mxu2 }
  0xce   :  { %v3474_v34 = vpop.f32.mrf.mxu0  ;;  %4828 = vst [vmem:[#allocation7_spill] sm:$0xff] %v3594_v44  ;;  %v3210_v44 = vld [vmem:[%s4815_s0 + $0x1f8] sm:$0xff] }
  0xcf   :  { %v1148_v32 = vadd.f32 %v3538_v62, %v3474_v34  ;;  %v1777_v34 = vmax.f32 %v1145_v36, 0.0 }
  0xd1   :  { %1186 = vmatmul.bf16.gmra.mxu0 %v3158_v33 }
  0xd2   :  { %1671 = vmatmul.bf16.gmra.mxu3 %v3255_v21 }
  0xd6   :  { %v3482_v37 = vpop.f32.mrf.mxu0 }
  0xd7   :  { %v1150_v24 = vadd.f32 %v3538_v62, %v3482_v37 }
  0xd9   :  { %v1779_v37 = vmax.f32 %v1150_v24, 0.0 }
  0xde   :  { %v3490_v40 = vpop.f32.mrf.mxu0 }
  0xdf   :  { %v1153_v20 = vadd.f32 %v3538_v62, %v3490_v40  ;;  %v1140_v40 = vadd.f32 %v3538_v62, %v3450_v25 }
  0xe1   :  { %1191 = vmatmul.bf16.gmra.mxu0 %v3159_v39  ;;  %v1780_v33 = vmax.f32 %v1153_v20, 0.0  ;;  %v1778_v39 = vmax.f32 %v1148_v32, 0.0  ;;  %v1775_v25 = vmax.f32 %v1140_v40, 0.0 }
  0xe6   :  { %v1154_v43 = vpop.f32.mrf.mxu0 }
  0xe7   :  { %v1155_v16 = vadd.f32 %v3538_v62, %v1154_v43  ;;  %v1776_v43 = vmax.f32 %v1143_v38, 0.0  ;;  %v3168_v38 = vld [vmem:[%s4815_s0 + $0xa8] sm:$0xff] }
  0xe9   :  { %v1781_v26 = vmax.f32 %v1155_v16, 0.0 }
  0xee   :  { %v1157_v46 = vpop.f32.mrf.mxu0 }
  0xef   :  { %v1158_v13 = vadd.f32 %v3538_v62, %v1157_v46  ;;  %v1133_v46 = vadd.f32 %v3538_v62, %v3435_v19  ;;  %v3613_v19 = vpop.f32.mrf.mxu2 }
  0xf0   :  { %4829 = vst [vmem:[#allocation8_spill] sm:$0xff] %v3613_v19 }
  0xf1   :  { %1196 = vmatmul.bf16.gmra.mxu0 %v3160_v45  ;;  %v1782_v22 = vmax.f32 %v1158_v13, 0.0  ;;  %v3229_v45 = vld [vmem:[%s4815_s0 + $0x290] sm:$0xff]  ;;  %v3198_v13 = vld [vmem:[%s4815_s0 + $0x198] sm:$0xff] }
  0xf2   :  { %1541 = vmatmul.bf16.gmra.mxu2 %v3229_v45  ;;  %1386 = vmatmul.bf16.gmra.mxu1 %v3198_v13  ;;  %v3200_v45 = vld [vmem:[%s4815_s0 + $0x1a8] sm:$0xff] }
  0xf6   :  { %v1159_v49 = vpop.f32.mrf.mxu0 }
  0xf7   :  { %v1160_v9 = vadd.f32 %v3538_v62, %v1159_v49 }
  0xf9   :  { %v1783_v17 = vmax.f32 %v1160_v9, 0.0 }
  0xfe   :  { %v1162_v52 = vpop.f32.mrf.mxu0 }
  0xff   :  { %v1163_v7 = vadd.f32 %v3538_v62, %v1162_v52  ;;  %v3165_v52 = vld [vmem:[%s4815_s0 + $0x90] sm:$0xff] }
 0x101   :  { %1201 = vmatmul.bf16.gmra.mxu0 %v3161_v51  ;;  %v1784_v14 = vmax.f32 %v1163_v7, 0.0  ;;  %v1772_v51 = vmax.f32 %v1133_v46, 0.0  ;;  %v3650_v7 = vpop.f32.mrf.mxu3 }
 0x102   :  { %1546 = vmatmul.bf16.gmra.mxu2 %v3230_v56  ;;  %4834 = vst [vmem:[#allocation13_spill] sm:$0xff] %v3650_v7  ;;  %v3234_v56 = vld [vmem:[%s4815_s0 + $0x2b8] sm:$0xff]  ;;  %v3208_v7 = vld [vmem:[%s4815_s0 + $0x1e8] sm:$0xff] }
 0x106   :  { %v1164_v55 = vpop.f32.mrf.mxu0 }
 0x107   :  { %v1165_v5 = vadd.f32 %v3538_v62, %v1164_v55  ;;  %v3622_v55 = vpop.f32.mrf.mxu2 }
 0x108   :  { %4830 = vst [vmem:[#allocation9_spill] sm:$0xff] %v3622_v55 }
 0x109   :  { %v1785_v10 = vmax.f32 %v1165_v5, 0.0  ;;  %v3667_v16 = vpop.f32.mrf.mxu3 }
 0x10a   :  { %4836 = vst [vmem:[#allocation15_spill] sm:$0xff] %v3667_v16 }
 0x10e   :  { %v1167_v59 = vpop.f32.mrf.mxu0 }
 0x10f   :  { %v1168_v2 = vadd.f32 %v3538_v62, %v1167_v59  ;;  %v3256_v59 = vld [vmem:[%s4815_s0 + $0x368] sm:$0xff] }
 0x110   :  { %1676 = vmatmul.bf16.gmra.mxu3 %v3256_v59 }
 0x111   :  { %1206 = vmatmul.bf16.gmra.mxu0 %v3162_v58  ;;  %v1786_v8 = vmax.f32 %v1168_v2, 0.0  ;;  %v3627_v58 = vpop.f32.mrf.mxu1  ;;  %v3166_v2 = vld [vmem:[%s4815_s0 + $0x98] sm:$0xff]  ;;  %v3678_v24 = vpop.f32.mrf.mxu3 }
 0x112   :  { %4838 = vst [vmem:[#allocation17_spill] sm:$0xff] %v3678_v24 }
 0x116   :  { %v1169_v0 = vpop.f32.mrf.mxu0 }
 0x117   :  { %v1170_v3 = vadd.f32 %v3538_v62, %v1169_v0  ;;  %v3637_v0 = vpop.f32.mrf.mxu2 }
 0x118   :  { %4831 = vst [vmem:[#allocation10_spill] sm:$0xff] %v3637_v0 }
 0x119   :  { %v1787_v6 = vmax.f32 %v1170_v3, 0.0  ;;  %v3644_v3 = vpop.f32.mrf.mxu1 }
 0x11b   :  { %2044 = vmatpush.msrb.mxu1 %v1787_v6 }
 0x11d   :  { %2045 = vmatpush.msrb.mxu1 %v1786_v8  ;;  %v3231_v8 = vld [vmem:[%s4815_s0 + $0x2a0] sm:$0xff] }
 0x11e   :  { %v3556_v12 = vpop.f32.mrf.mxu0  ;;  %1551 = vmatmul.bf16.gmra.mxu2 %v3231_v8  ;;  %v3201_v8 = vld [vmem:[%s4815_s0 + $0x1b0] sm:$0xff] }
 0x11f   :  { %2046 = vmatpush.msrb.mxu1 %v1785_v10  ;;  %v3648_v6 = vpop.f32.mrf.mxu2  ;;  %v3257_v10 = vld [vmem:[%s4815_s0 + $0x370] sm:$0xff] }
 0x120   :  { %4833 = vst [vmem:[#allocation12_spill] sm:$0xff] %v3648_v6  ;;  %1681 = vmatmul.bf16.gmra.mxu3 %v3257_v10 }
 0x121   :  { %1211 = vmatmul.bf16.gmra.mxu0 %v3163_v11  ;;  %2047 = vmatpush.msrb.mxu1 %v1784_v14  ;;  %v3655_v9 = vpop.f32.mrf.mxu1 }
 0x123   :  { %2048 = vmatpush.msrb.mxu1 %v1783_v17  ;;  %v3167_v17 = vld [vmem:[%s4815_s0 + $0xa0] sm:$0xff] }
 0x125   :  { %2049 = vmatpush.msrb.mxu1 %v1782_v22 }
 0x126   :  { %v3572_v29 = vpop.f32.mrf.mxu0 }
 0x127   :  { %2050 = vmatpush.msrb.mxu1 %v1781_v26  ;;  %v3665_v14 = vpop.f32.mrf.mxu2  ;;  %v3232_v26 = vld [vmem:[%s4815_s0 + $0x2a8] sm:$0xff] }
 0x128   :  { %4835 = vst [vmem:[#allocation14_spill] sm:$0xff] %v3665_v14 }
 0x129   :  { %2051 = vmatpush.msrb.mxu1 %v1780_v33  ;;  %v3672_v18 = vpop.f32.mrf.mxu1  ;;  %v3199_v33 = vld [vmem:[%s4815_s0 + $0x1a0] sm:$0xff] }
 0x12a   :  { %1391 = vmatmul.bf16.gmra.mxu1 %v3199_v33 }
 0x12b   :  { %2052 = vmatpush.msrb.mxu1 %v1779_v37  ;;  %v3695_v37 = vpop.f32.mrf.mxu3 }
 0x12c   :  { %4839 = vst [vmem:[#allocation18_spill] sm:$0xff] %v3695_v37 }
 0x12d   :  { %2053 = vmatpush.msrb.mxu1 %v1778_v39 }
 0x12e   :  { %v3590_v42 = vpop.f32.mrf.mxu0  ;;  %1556 = vmatmul.bf16.gmra.mxu2 %v3232_v26 }
 0x12f   :  { %2054 = vmatpush.msrb.mxu1 %v1777_v34  ;;  %v3676_v22 = vpop.f32.mrf.mxu2 }
 0x130   :  { %4837 = vst [vmem:[#allocation16_spill] sm:$0xff] %v3676_v22  ;;  %1686 = vmatmul.bf16.gmra.mxu3 %v3258_v30 }
 0x131   :  { %1216 = vmatmul.bf16.gmra.mxu0 %v3164_v41  ;;  %2055 = vmatpush.msrb.mxu1 %v1776_v43  ;;  %v3683_v27 = vpop.f32.mrf.mxu1 }
 0x133   :  { %2056 = vmatpush.msrb.mxu1 %v1775_v25  ;;  %v3704_v41 = vpop.f32.mrf.mxu3 }
 0x134   :  { %4840 = vst [vmem:[#allocation19_spill] sm:$0xff] %v3704_v41  ;;  %v3209_v41 = vld [vmem:[%s4815_s0 + $0x1f0] sm:$0xff] }
 0x135   :  { %2057 = vmatpush.msrb.mxu1 %v1774_v47 }
 0x136   :  { %v3608_v49 = vpop.f32.mrf.mxu0 }
 0x137   :  { %2058 = vmatpush.msrb.mxu1 %v1773_v23  ;;  %v3693_v36 = vpop.f32.mrf.mxu2  ;;  %v3169_v23 = vld [vmem:[%s4815_s0 + $0xb0] sm:$0xff] }
 0x139   :  { %2059 = vmatpush.msrb.mxu1 %v1772_v51  ;;  %v3700_v39 = vpop.f32.mrf.mxu1 }
 0x13a   :  { %1396 = vmatmul.bf16.gmra.mxu1 %v3200_v45  ;;  %v3261_v45 = vld [vmem:[%s4815_s0 + $0x390] sm:$0xff] }
 0x13b   :  { %v3719_v47 = vpop.f32.mrf.mxu3 }
 0x13c   :  { %4841 = vst [vmem:[#allocation20_spill] sm:$0xff] %v3719_v47 }
 0x13e   :  { %v3620_v54 = vpop.f32.mrf.mxu0  ;;  %1561 = vmatmul.bf16.gmra.mxu2 %v3233_v31  ;;  %v3235_v31 = vld [vmem:[%s4815_s0 + $0x2c0] sm:$0xff] }
 0x13f   :  { %v3702_v34 = vpop.f32.mrf.mxu2 }
 0x140   :  { %1691 = vmatmul.bf16.gmra.mxu3 %v3259_v28 }
 0x141   :  { %1221 = vmatmul.bf16.gmra.mxu0 %v3165_v52  ;;  %v3709_v43 = vpop.f32.mrf.mxu1 }
 0x143   :  { %v3728_v52 = vpop.f32.mrf.mxu3 }
 0x144   :  { %4842 = vst [vmem:[#allocation21_spill] sm:$0xff] %v3728_v52 }
 0x146   :  { %v3632_v61 = vpop.f32.mrf.mxu0 }
 0x147   :  { %v3717_v46 = vpop.f32.mrf.mxu2 }
 0x149   :  { %v3724_v21 = vpop.f32.mrf.mxu1 }
 0x14a   :  { %1401 = vmatmul.bf16.gmra.mxu1 %v3201_v8 }
 0x14b   :  { %v3743_v13 = vpop.f32.mrf.mxu3 }
 0x14c   :  { %4843 = vst [vmem:[#allocation22_spill] sm:$0xff] %v3743_v13 }
 0x14e   :  { %v3646_v5 = vpop.f32.mrf.mxu0  ;;  %1566 = vmatmul.bf16.gmra.mxu2 %v3234_v56  ;;  %v3202_v56 = vld [vmem:[%s4815_s0 + $0x1b8] sm:$0xff] }
 0x14f   :  { %v3726_v51 = vpop.f32.mrf.mxu2 }
 0x150   :  { %1696 = vmatmul.bf16.gmra.mxu3 %v3260_v63 }
 0x151   :  { %1226 = vmatmul.bf16.gmra.mxu0 %v3166_v2  ;;  %v3733_v59 = vpop.f32.mrf.mxu1 }
 0x156   :  { %v3660_v11 = vpop.f32.mrf.mxu0 }
 0x157   :  { %v3741_v10 = vpop.f32.mrf.mxu2 }
 0x159   :  { %v3748_v26 = vpop.f32.mrf.mxu1 }
 0x15a   :  { %1406 = vmatmul.bf16.gmra.mxu1 %v3202_v56 }
 0x15e   :  { %v3674_v20 = vpop.f32.mrf.mxu0  ;;  %1571 = vmatmul.bf16.gmra.mxu2 %v3235_v31 }
 0x15f   :  { %v3750_v33 = vpop.f32.mrf.mxu2 }
 0x160   :  { %1701 = vmatmul.bf16.gmra.mxu3 %v3261_v45 }
 0x161   :  { %1231 = vmatmul.bf16.gmra.mxu0 %v3167_v17  ;;  %v3170_v17 = vld [vmem:[%s4815_s0 + $0xb8] sm:$0xff]  ;;  %v3757_v28 = vpop.f32.mrf.mxu1 }
 0x166   :  { %v3688_v32 = vpop.f32.mrf.mxu0 }
 0x16e   :  { %v1197_v40 = vpop.f32.mrf.mxu0 }
 0x171   :  { %1236 = vmatmul.bf16.gmra.mxu0 %v3168_v38  ;;  %v3752_v38 = vpop.f32.mrf.mxu3 }
 0x172   :  { %4844 = vst [vmem:[#allocation23_spill] sm:$0xff] %v3752_v38 }
 0x176   :  { %v1199_v25 = vpop.f32.mrf.mxu0 }
 0x177   :  { %v1200_v57 = vadd.f32 %v3538_v62, %v1199_v25 }
 0x179   :  { %v3770_v52 = vpop.f32.mrf.mxu3  ;;  %v1799_v25 = vmax.f32 %v1200_v57, 0.0  ;;  %v3262_v57 = vld [vmem:[%s4815_s0 + $0x398] sm:$0xff] }
 0x17a   :  { %4846 = vst [vmem:[#allocation25_spill] sm:$0xff] %v3770_v52  ;;  %1706 = vmatmul.bf16.gmra.mxu3 %v3262_v57 }
 0x17e   :  { %v1202_v50 = vpop.f32.mrf.mxu0 }
 0x17f   :  { %v1203_v13 = vadd.f32 %v3538_v62, %v1202_v50 }
 0x181   :  { %1241 = vmatmul.bf16.gmra.mxu0 %v3169_v23  ;;  %v1800_v56 = vmax.f32 %v1203_v13, 0.0  ;;  %v3786_v50 = vpop.f32.mrf.mxu3 }
 0x182   :  { %4848 = vst [vmem:[#allocation27_spill] sm:$0xff] %v3786_v50 }
 0x186   :  { %v1204_v2 = vpop.f32.mrf.mxu0 }
 0x187   :  { %v1205_v31 = vadd.f32 %v3538_v62, %v1204_v2  ;;  %v1198_v2 = vadd.f32 %v3538_v62, %v1197_v40 }
 0x189   :  { %v1801_v60 = vmax.f32 %v1205_v31, 0.0  ;;  %v1798_v40 = vmax.f32 %v1198_v2, 0.0 }
 0x18e   :  { %v1207_v30 = vpop.f32.mrf.mxu0 }
 0x18f   :  { %v1208_v63 = vadd.f32 %v3538_v62, %v1207_v30  ;;  %v3171_v30 = vld [vmem:[%s4815_s0 + $0xc0] sm:$0xff] }
 0x191   :  { %1246 = vmatmul.bf16.gmra.mxu0 %v3170_v17  ;;  %v3767_v17 = vpop.f32.mrf.mxu2  ;;  %v1802_v38 = vmax.f32 %v1208_v63, 0.0  ;;  %v1193_v63 = vadd.f32 %v3538_v62, %v3674_v20  ;;  %v3203_v20 = vld [vmem:[%s4815_s0 + $0x1c0] sm:$0xff] }
 0x192   :  { %4845 = vst [vmem:[#allocation24_spill] sm:$0xff] %v3767_v17  ;;  %1411 = vmatmul.bf16.gmra.mxu1 %v3203_v20  ;;  %v3206_v17 = vld [vmem:[%s4815_s0 + $0x1d8] sm:$0xff] }
 0x193   :  { %v1796_v2 = vmax.f32 %v1193_v63, 0.0 }
 0x196   :  { %v1209_v23 = vpop.f32.mrf.mxu0 }
 0x197   :  { %v1210_v8 = vadd.f32 %v3538_v62, %v1209_v23  ;;  %v3777_v23 = vpop.f32.mrf.mxu1 }
 0x199   :  { %v1803_v47 = vmax.f32 %v1210_v8, 0.0  ;;  %v3782_v8 = vpop.f32.mrf.mxu2 }
 0x19a   :  { %4847 = vst [vmem:[#allocation26_spill] sm:$0xff] %v3782_v8 }
 0x19b   :  { %2064 = vmatpush.msrb.mxu2 %v1803_v47  ;;  %v1195_v47 = vadd.f32 %v3538_v62, %v3688_v32 }
 0x19d   :  { %2065 = vmatpush.msrb.mxu2 %v1802_v38  ;;  %v3236_v38 = vld [vmem:[%s4815_s0 + $0x2c8] sm:$0xff]  ;;  %v1797_v32 = vmax.f32 %v1195_v47, 0.0 }
 0x19e   :  { %v3779_v45 = vpop.f32.mrf.mxu0  ;;  %1576 = vmatmul.bf16.gmra.mxu2 %v3236_v38  ;;  %v1183_v38 = vadd.f32 %v3538_v62, %v3620_v54 }
 0x19f   :  { %2066 = vmatpush.msrb.mxu2 %v1801_v60  ;;  %v1190_v60 = vadd.f32 %v3538_v62, %v3660_v11  ;;  %v3795_v13 = vpop.f32.mrf.mxu1 }
 0x1a0   :  { %v1792_v20 = vmax.f32 %v1183_v38, 0.0 }
 0x1a1   :  { %1251 = vmatmul.bf16.gmra.mxu0 %v3171_v30  ;;  %2067 = vmatpush.msrb.mxu2 %v1800_v56  ;;  %v1188_v30 = vadd.f32 %v3538_v62, %v3646_v5  ;;  %v3807_v11 = vpop.f32.mrf.mxu2  ;;  %v1185_v56 = vadd.f32 %v3538_v62, %v3632_v61  ;;  %v1795_v47 = vmax.f32 %v1190_v60, 0.0  ;;  %v1180_v5 = vadd.f32 %v3538_v62, %v3608_v49 }
 0x1a2   :  { %4849 = vst [vmem:[#allocation28_spill] sm:$0xff] %v3807_v11  ;;  %v1178_v60 = vadd.f32 %v3538_v62, %v3590_v42  ;;  %v1175_v49 = vadd.f32 %v3538_v62, %v3572_v29  ;;  %v3263_v29 = vld [vmem:[%s4815_s0 + $0x3a0] sm:$0xff] }
 0x1a3   :  { %2068 = vmatpush.msrb.mxu2 %v1799_v25  ;;  %v3811_v25 = vpop.f32.mrf.mxu3  ;;  %v1793_v63 = vmax.f32 %v1185_v56, 0.0  ;;  %v3237_v56 = vld [vmem:[%s4815_s0 + $0x2d0] sm:$0xff]  ;;  %1711 = vmatmul.bf16.gmra.mxu3 %v3263_v29  ;;  %v3264_v29 = vld [vmem:[%s4815_s0 + $0x3a8] sm:$0xff] }
 0x1a4   :  { %4850 = vst [vmem:[#allocation29_spill] sm:$0xff] %v3811_v25  ;;  %v1790_v42 = vmax.f32 %v1178_v60, 0.0  ;;  %v1789_v38 = vmax.f32 %v1175_v49, 0.0 }
 0x1a5   :  { %2069 = vmatpush.msrb.mxu2 %v1798_v40  ;;  %v1794_v40 = vmax.f32 %v1188_v30, 0.0  ;;  %v1791_v30 = vmax.f32 %v1180_v5, 0.0 }
 0x1a6   :  { %v3800_v31 = vpop.f32.mrf.mxu0 }
 0x1a7   :  { %2070 = vmatpush.msrb.mxu2 %v1797_v32  ;;  %v3172_v32 = vld [vmem:[%s4815_s0 + $0xc8] sm:$0xff]  ;;  %v3820_v57 = vpop.f32.mrf.mxu1 }
 0x1a9   :  { %2071 = vmatpush.msrb.mxu2 %v1796_v2  ;;  %v3826_v54 = vpop.f32.mrf.mxu2 }
 0x1aa   :  { %4851 = vst [vmem:[#allocation30_spill] sm:$0xff] %v3826_v54 }
 0x1ab   :  { %2072 = vmatpush.msrb.mxu2 %v1795_v47  ;;  %v3830_v2 = vpop.f32.mrf.mxu3  ;;  %v1173_v47 = vadd.f32 %v3538_v62, %v3556_v12 }
 0x1ac   :  { %4852 = vst [vmem:[#allocation31_spill] sm:$0xff] %v3830_v2 }
 0x1ad   :  { %2073 = vmatpush.msrb.mxu2 %v1794_v40 }
 0x1ae   :  { %v3822_v61 = vpop.f32.mrf.mxu0  ;;  %1581 = vmatmul.bf16.gmra.mxu2 %v3237_v56 }
 0x1af   :  { %2074 = vmatpush.msrb.mxu2 %v1793_v63  ;;  %v3837_v40 = vpop.f32.mrf.mxu1  ;;  %v3204_v63 = vld [vmem:[%s4815_s0 + $0x1c8] sm:$0xff] }
 0x1b0   :  { %1416 = vmatmul.bf16.gmra.mxu1 %v3204_v63 }
 0x1b1   :  { %1256 = vmatmul.bf16.gmra.mxu0 %v3172_v32  ;;  %2075 = vmatpush.msrb.mxu2 %v1792_v20  ;;  %v1788_v32 = vmax.f32 %v1173_v47, 0.0  ;;  %v3847_v12 = vpop.f32.mrf.mxu2  ;;  %v3173_v20 = vld [vmem:[%s4815_s0 + $0xd0] sm:$0xff] }
 0x1b2   :  { %4853 = vst [vmem:[#allocation32_spill] sm:$0xff] %v3847_v12 }
 0x1b3   :  { %2076 = vmatpush.msrb.mxu2 %v1791_v30  ;;  %v3849_v60 = vpop.f32.mrf.mxu3  ;;  %1716 = vmatmul.bf16.gmra.mxu3 %v3264_v29  ;;  %v3239_v29 = vld [vmem:[%s4815_s0 + $0x2e0] sm:$0xff] }
 0x1b4   :  { %4854 = vst [vmem:[#allocation33_spill] sm:$0xff] %v3849_v60 }
 0x1b5   :  { %2077 = vmatpush.msrb.mxu2 %v1790_v42  ;;  %v3238_v42 = vld [vmem:[%s4815_s0 + $0x2d8] sm:$0xff] }
 0x1b6   :  { %v3842_v5 = vpop.f32.mrf.mxu0 }
 0x1b7   :  { %2078 = vmatpush.msrb.mxu2 %v1789_v38  ;;  %v3854_v49 = vpop.f32.mrf.mxu1 }
 0x1b9   :  { %2079 = vmatpush.msrb.mxu2 %v1788_v32  ;;  %v3858_v56 = vpop.f32.mrf.mxu2  ;;  %v3205_v32 = vld [vmem:[%s4815_s0 + $0x1d0] sm:$0xff] }
 0x1ba   :  { %4855 = vst [vmem:[#allocation34_spill] sm:$0xff] %v3858_v56 }
 0x1bb   :  { %v3860_v47 = vpop.f32.mrf.mxu3 }
 0x1bc   :  { %4856 = vst [vmem:[#allocation35_spill] sm:$0xff] %v3860_v47  ;;  %v3265_v47 = vld [vmem:[%s4815_s0 + $0x3b0] sm:$0xff] }
 0x1be   :  { %v3856_v30 = vpop.f32.mrf.mxu0  ;;  %1586 = vmatmul.bf16.gmra.mxu2 %v3238_v42  ;;  %v3174_v42 = vld [vmem:[%s4815_s0 + $0xd8] sm:$0xff] }
 0x1bf   :  { %v3865_v38 = vpop.f32.mrf.mxu1 }
 0x1c0   :  { %1421 = vmatmul.bf16.gmra.mxu1 %v3205_v32 }
 0x1c1   :  { %1261 = vmatmul.bf16.gmra.mxu0 %v3173_v20  ;;  %v3875_v20 = vpop.f32.mrf.mxu2 }
 0x1c2   :  { %4857 = vst [vmem:[#allocation36_spill] sm:$0xff] %v3875_v20  ;;  %v3207_v20 = vld [vmem:[%s4815_s0 + $0x1e0] sm:$0xff] }
 0x1c3   :  { %v3877_v52 = vpop.f32.mrf.mxu3  ;;  %1721 = vmatmul.bf16.gmra.mxu3 %v3265_v47  ;;  %v3240_v47 = vld [vmem:[%s4815_s0 + $0x2e8] sm:$0xff] }
 0x1c4   :  { %4858 = vst [vmem:[#allocation37_spill] sm:$0xff] %v3877_v52 }
 0x1c6   :  { %v3870_v63 = vpop.f32.mrf.mxu0 }
 0x1c7   :  { %v3882_v50 = vpop.f32.mrf.mxu1 }
 0x1c9   :  { %v3886_v2 = vpop.f32.mrf.mxu2 }
 0x1ca   :  { %4859 = vst [vmem:[#allocation38_spill] sm:$0xff] %v3886_v2 }
 0x1cb   :  { %v3888_v60 = vpop.f32.mrf.mxu3 }
 0x1cc   :  { %4860 = vst [vmem:[#allocation39_spill] sm:$0xff] %v3888_v60 }
 0x1ce   :  { %v3884_v25 = vpop.f32.mrf.mxu0  ;;  %1591 = vmatmul.bf16.gmra.mxu2 %v3239_v29  ;;  %v3175_v29 = vld [vmem:[%s4815_s0 + $0xe0] sm:$0xff] }
 0x1cf   :  { %v3893_v32 = vpop.f32.mrf.mxu1 }
 0x1d0   :  { %1426 = vmatmul.bf16.gmra.mxu1 %v3206_v17 }
 0x1d1   :  { %1266 = vmatmul.bf16.gmra.mxu0 %v3174_v42  ;;  %v3903_v42 = vpop.f32.mrf.mxu2 }
 0x1d2   :  { %4861 = vst [vmem:[#allocation40_spill] sm:$0xff] %v3903_v42 }
 0x1d3   :  { %v3905_v60 = vpop.f32.mrf.mxu3 }
 0x1d4   :  { %4862 = vst [vmem:[#allocation41_spill] sm:$0xff] %v3905_v60  ;;  %v3266_v60 = vld [vmem:[%s4815_s0 + $0x3b8] sm:$0xff] }
 0x1d5   :  { %1726 = vmatmul.bf16.gmra.mxu3 %v3266_v60 }
 0x1d6   :  { %v3898_v52 = vpop.f32.mrf.mxu0 }
 0x1d7   :  { %v3910_v8 = vpop.f32.mrf.mxu1 }
 0x1d9   :  { %v3914_v54 = vpop.f32.mrf.mxu2 }
 0x1da   :  { %4863 = vst [vmem:[#allocation42_spill] sm:$0xff] %v3914_v54 }
 0x1db   :  { %v3916_v12 = vpop.f32.mrf.mxu3 }
 0x1dc   :  { %4864 = vst [vmem:[#allocation43_spill] sm:$0xff] %v3916_v12 }
 0x1de   :  { %v3912_v11 = vpop.f32.mrf.mxu0  ;;  %1596 = vmatmul.bf16.gmra.mxu2 %v3240_v47  ;;  %v3176_v47 = vld [vmem:[%s4815_s0 + $0xe8] sm:$0xff] }
 0x1df   :  { %v3921_v17 = vpop.f32.mrf.mxu1 }
 0x1e0   :  { %1431 = vmatmul.bf16.gmra.mxu1 %v3207_v20  ;;  %v3267_v20 = vld [vmem:[%s4815_s0 + $0x3c0] sm:$0xff] }
 0x1e1   :  { %1271 = vmatmul.bf16.gmra.mxu0 %v3175_v29  ;;  %v3931_v29 = vpop.f32.mrf.mxu2 }
 0x1e2   :  { %4865 = vst [vmem:[#allocation44_spill] sm:$0xff] %v3931_v29  ;;  %v3241_v29 = vld [vmem:[%s4815_s0 + $0x2f0] sm:$0xff] }
 0x1e3   :  { %v3933_v12 = vpop.f32.mrf.mxu3 }
 0x1e4   :  { %4866 = vst [vmem:[#allocation45_spill] sm:$0xff] %v3933_v12 }
 0x1e5   :  { %1731 = vmatmul.bf16.gmra.mxu3 %v3267_v20  ;;  %v3268_v20 = vld [vmem:[%s4815_s0 + $0x3c8] sm:$0xff] }
 0x1e6   :  { %v3926_v56 = vpop.f32.mrf.mxu0 }
 0x1e7   :  { %v3938_v2 = vpop.f32.mrf.mxu1 }
 0x1e9   :  { %v3940_v54 = vpop.f32.mrf.mxu2 }
 0x1ea   :  { %4867 = vst [vmem:[#allocation46_spill] sm:$0xff] %v3940_v54 }
 0x1eb   :  { %v3942_v1 = vpop.f32.mrf.mxu3 }
 0x1ec   :  { %4868 = vst [vmem:[#allocation47_spill] sm:$0xff] %v3942_v1 }
 0x1ee   :  { %v1237_v42 = vpop.f32.mrf.mxu0  ;;  %1601 = vmatmul.bf16.gmra.mxu2 %v3241_v29  ;;  %v3177_v29 = vld [vmem:[%s4815_s0 + $0xf0] sm:$0xff] }
 0x1ef   :  { %v3947_v60 = vpop.f32.mrf.mxu1 }
 0x1f0   :  { %1436 = vmatmul.bf16.gmra.mxu1 %v3208_v7 }
 0x1f1   :  { %1276 = vmatmul.bf16.gmra.mxu0 %v3176_v47  ;;  %v3955_v54 = vpop.f32.mrf.mxu2 }
 0x1f2   :  { %4869 = vst [vmem:[#allocation48_spill] sm:$0xff] %v3955_v54  ;;  %v3242_v54 = vld [vmem:[%s4815_s0 + $0x2f8] sm:$0xff] }
 0x1f3   :  { %v3957_v47 = vpop.f32.mrf.mxu3 }
 0x1f4   :  { %4870 = vst [vmem:[#allocation49_spill] sm:$0xff] %v3957_v47 }
 0x1f5   :  { %1736 = vmatmul.bf16.gmra.mxu3 %v3268_v20  ;;  %v3269_v20 = vld [vmem:[%s4815_s0 + $0x3d0] sm:$0xff] }
 0x1f6   :  { %v1239_v12 = vpop.f32.mrf.mxu0 }
 0x1f7   :  { %v3962_v1 = vpop.f32.mrf.mxu1  ;;  %v1240_v14 = vadd.f32 %v3538_v62, %v1239_v12  ;;  %v3244_v12 = vld [vmem:[%s4815_s0 + $0x308] sm:$0xff] }
 0x1f9   :  { %v3964_v24 = vpop.f32.mrf.mxu2 }
 0x1fa   :  { %4871 = vst [vmem:[#allocation50_spill] sm:$0xff] %v3964_v24 }
 0x1fb   :  { %v3966_v37 = vpop.f32.mrf.mxu3 }
 0x1fc   :  { %4872 = vst [vmem:[#allocation51_spill] sm:$0xff] %v3966_v37 }
 0x1fe   :  { %v1242_v16 = vpop.f32.mrf.mxu0  ;;  %1606 = vmatmul.bf16.gmra.mxu2 %v3242_v54  ;;  %v3178_v54 = vld [vmem:[%s4815_s0 + $0xf8] sm:$0xff] }
 0x1ff   :  { %v3971_v7 = vpop.f32.mrf.mxu1  ;;  %v1243_v0 = vadd.f32 %v3538_v62, %v1242_v16 }
 0x200   :  { %1441 = vmatmul.bf16.gmra.mxu1 %v3209_v41 }
 0x201   :  { %1281 = vmatmul.bf16.gmra.mxu0 %v3177_v29  ;;  %v3979_v24 = vpop.f32.mrf.mxu2 }
 0x202   :  { %4873 = vst [vmem:[#allocation52_spill] sm:$0xff] %v3979_v24  ;;  %v3243_v24 = vld [vmem:[%s4815_s0 + $0x300] sm:$0xff] }
 0x203   :  { %v3981_v29 = vpop.f32.mrf.mxu3 }
 0x204   :  { %4874 = vst [vmem:[#allocation53_spill] sm:$0xff] %v3981_v29 }
 0x205   :  { %1741 = vmatmul.bf16.gmra.mxu3 %v3269_v20 }
 0x206   :  { %v1244_v47 = vpop.f32.mrf.mxu0 }
 0x207   :  { %v3986_v37 = vpop.f32.mrf.mxu1 }
 0x209   :  { %v3988_v15 = vpop.f32.mrf.mxu2 }
 0x20a   :  { %4875 = vst [vmem:[#allocation54_spill] sm:$0xff] %v3988_v15 }
 0x20b   :  { %v3990_v35 = vpop.f32.mrf.mxu3 }
 0x20c   :  { %4876 = vst [vmem:[#allocation55_spill] sm:$0xff] %v3990_v35 }
 0x20e   :  { %v1247_v4 = vpop.f32.mrf.mxu0  ;;  %1611 = vmatmul.bf16.gmra.mxu2 %v3243_v24  ;;  %v1245_v24 = vadd.f32 %v3538_v62, %v1244_v47  ;;  %v1816_v47 = vmax.f32 %v1243_v0, 0.0  ;;  %v1230_v0 = vadd.f32 %v3538_v62, %v3898_v52 }
 0x20f   :  { %v3995_v41 = vpop.f32.mrf.mxu1 }
 0x210   :  { %1446 = vmatmul.bf16.gmra.mxu1 %v3210_v44  ;;  %v1817_v22 = vmax.f32 %v1245_v24, 0.0 }
 0x211   :  { %1286 = vmatmul.bf16.gmra.mxu0 %v3178_v54  ;;  %v1248_v54 = vadd.f32 %v3538_v62, %v1247_v4  ;;  %v4005_v15 = vpop.f32.mrf.mxu2  ;;  %v3179_v4 = vld [vmem:[%s4815_s0 + $0x100] sm:$0xff] }
 0x212   :  { %4877 = vst [vmem:[#allocation56_spill] sm:$0xff] %v4005_v15 }
 0x213   :  { %v4008_v55 = vpop.f32.mrf.mxu3  ;;  %v1818_v6 = vmax.f32 %v1248_v54, 0.0  ;;  %v1233_v54 = vadd.f32 %v3538_v62, %v3912_v11  ;;  %v3211_v11 = vld [vmem:[%s4815_s0 + $0x200] sm:$0xff] }
 0x214   :  { %4878 = vst [vmem:[#allocation57_spill] sm:$0xff] %v4008_v55 }
 0x216   :  { %v1249_v29 = vpop.f32.mrf.mxu0 }
 0x217   :  { %v1250_v35 = vadd.f32 %v3538_v62, %v1249_v29  ;;  %v4015_v29 = vpop.f32.mrf.mxu1 }
 0x219   :  { %v1819_v19 = vmax.f32 %v1250_v35, 0.0  ;;  %v1238_v35 = vadd.f32 %v3538_v62, %v1237_v42  ;;  %v4020_v20 = vpop.f32.mrf.mxu2 }
 0x21a   :  { %4879 = vst [vmem:[#allocation58_spill] sm:$0xff] %v4020_v20 }
 0x21b   :  { %2084 = vmatpush.msrb.mxu3 %v1819_v19  ;;  %v1235_v19 = vadd.f32 %v3538_v62, %v3926_v56  ;;  %v4024_v16 = vpop.f32.mrf.mxu3  ;;  %v1814_v42 = vmax.f32 %v1238_v35, 0.0  ;;  %v1812_v35 = vmax.f32 %v1233_v54, 0.0 }
 0x21c   :  { %4880 = vst [vmem:[#allocation59_spill] sm:$0xff] %v4024_v16 }
 0x21d   :  { %2085 = vmatpush.msrb.mxu3 %v1818_v6  ;;  %v1815_v6 = vmax.f32 %v1240_v14, 0.0  ;;  %v3270_v14 = vld [vmem:[%s4815_s0 + $0x3d8] sm:$0xff] }
 0x21e   :  { %v4017_v44 = vpop.f32.mrf.mxu0  ;;  %1616 = vmatmul.bf16.gmra.mxu2 %v3244_v12  ;;  %1746 = vmatmul.bf16.gmra.mxu3 %v3270_v14  ;;  %v1223_v12 = vadd.f32 %v3538_v62, %v3856_v30 }
 0x21f   :  { %2086 = vmatpush.msrb.mxu3 %v1817_v22  ;;  %v1813_v22 = vmax.f32 %v1235_v19, 0.0  ;;  %v4033_v56 = vpop.f32.mrf.mxu1  ;;  %v1811_v19 = vmax.f32 %v1230_v0, 0.0  ;;  %v1218_v0 = vadd.f32 %v3538_v62, %v3822_v61 }
 0x220   :  { %4881 = vst [vmem:[#allocation60_spill] sm:$0xff] %v4033_v56  ;;  %1451 = vmatmul.bf16.gmra.mxu1 %v3211_v11  ;;  %v1808_v11 = vmax.f32 %v1223_v12, 0.0  ;;  %v1370_v12 = vadd.f32 %v3538_v62, %v3777_v23 }
 0x221   :  { %1291 = vmatmul.bf16.gmra.mxu0 %v3179_v4  ;;  %2087 = vmatpush.msrb.mxu3 %v1816_v47  ;;  %v1228_v4 = vadd.f32 %v3538_v62, %v3884_v25  ;;  %v4045_v52 = vpop.f32.mrf.mxu2  ;;  %v1225_v47 = vadd.f32 %v3538_v62, %v3870_v63  ;;  %v1220_v25 = vadd.f32 %v3538_v62, %v3842_v5  ;;  %v1806_v61 = vmax.f32 %v1218_v0, 0.0 }
 0x222   :  { %4882 = vst [vmem:[#allocation61_spill] sm:$0xff] %v4045_v52  ;;  %v1215_v5 = vadd.f32 %v3538_v62, %v3800_v31 }
 0x223   :  { %2088 = vmatpush.msrb.mxu3 %v1815_v6  ;;  %v4049_v6 = vpop.f32.mrf.mxu3  ;;  %v1809_v54 = vmax.f32 %v1225_v47, 0.0  ;;  %v3245_v47 = vld [vmem:[%s4815_s0 + $0x310] sm:$0xff] }
 0x224   :  { %4883 = vst [vmem:[#allocation62_spill] sm:$0xff] %v4049_v6  ;;  %v1805_v31 = vmax.f32 %v1215_v5, 0.0  ;;  %v1867_v5 = vmax.f32 %v1370_v12, 0.0 }
 0x225   :  { %2089 = vmatpush.msrb.mxu3 %v1814_v42  ;;  %v1810_v42 = vmax.f32 %v1228_v4, 0.0  ;;  %v1807_v4 = vmax.f32 %v1220_v25, 0.0  ;;  %v3271_v25 = vld [vmem:[%s4815_s0 + $0x3e0] sm:$0xff] }
 0x226   :  { %v4038_v24 = vpop.f32.mrf.mxu0 }
 0x227   :  { %2090 = vmatpush.msrb.mxu3 %v1813_v22  ;;  %v3180_v22 = vld [vmem:[%s4815_s0 + $0x108] sm:$0xff]  ;;  %v4058_v14 = vpop.f32.mrf.mxu1 }
 0x228   :  { %4884 = vst [vmem:[#allocation63_spill] sm:$0xff] %v4058_v14 }
 0x229   :  { %2091 = vmatpush.msrb.mxu3 %v1812_v35  ;;  %v4064_v30 = vpop.f32.mrf.mxu2 }
 0x22a   :  { %4885 = vst [vmem:[#allocation64_spill] sm:$0xff] %v4064_v30 }
 0x22b   :  { %2092 = vmatpush.msrb.mxu3 %v1811_v19  ;;  %v4068_v35 = vpop.f32.mrf.mxu3  ;;  %v1213_v19 = vadd.f32 %v3538_v62, %v3779_v45  ;;  %v3212_v45 = vld [vmem:[%s4815_s0 + $0x208] sm:$0xff] }
 0x22c   :  { %4886 = vst [vmem:[#allocation65_spill] sm:$0xff] %v4068_v35 }
 0x22d   :  { %2093 = vmatpush.msrb.mxu3 %v1810_v42  ;;  %v1804_v0 = vmax.f32 %v1213_v19, 0.0  ;;  %v1360_v19 = vadd.f32 %v3538_v62, %v3724_v21  ;;  %v1355_v21 = vadd.f32 %v3538_v62, %v3700_v39 }
 0x22e   :  { %v4060_v63 = vpop.f32.mrf.mxu0  ;;  %1621 = vmatmul.bf16.gmra.mxu2 %v3245_v47  ;;  %1751 = vmatmul.bf16.gmra.mxu3 %v3271_v25 }
 0x22f   :  { %2094 = vmatpush.msrb.mxu3 %v1809_v54  ;;  %v4077_v42 = vpop.f32.mrf.mxu1  ;;  %v1368_v54 = vadd.f32 %v3538_v62, %v3757_v28  ;;  %v1363_v28 = vadd.f32 %v3538_v62, %v3733_v59 }
 0x230   :  { %4887 = vst [vmem:[#allocation66_spill] sm:$0xff] %v4077_v42  ;;  %1456 = vmatmul.bf16.gmra.mxu1 %v3212_v45  ;;  %v1863_v45 = vmax.f32 %v1360_v19, 0.0  ;;  %v1348_v19 = vadd.f32 %v3538_v62, %v3655_v9  ;;  %v1343_v9 = vadd.f32 %v3538_v62, %v3627_v58 }
 0x231   :  { %1296 = vmatmul.bf16.gmra.mxu0 %v3180_v22  ;;  %2095 = vmatpush.msrb.mxu3 %v1808_v11  ;;  %v4089_v23 = vpop.f32.mrf.mxu2  ;;  %v1365_v11 = vadd.f32 %v3538_v62, %v3748_v26  ;;  %v3181_v26 = vld [vmem:[%s4815_s0 + $0x110] sm:$0xff]  ;;  %v1864_v25 = vmax.f32 %v1363_v28, 0.0  ;;  %v1350_v28 = vadd.f32 %v3538_v62, %v3672_v18 }
 0x232   :  { %4888 = vst [vmem:[#allocation67_spill] sm:$0xff] %v4089_v23  ;;  %v3213_v18 = vld [vmem:[%s4815_s0 + $0x210] sm:$0xff] }
 0x233   :  { %2096 = vmatpush.msrb.mxu3 %v1807_v4  ;;  %v1866_v4 = vmax.f32 %v1368_v54, 0.0  ;;  %v4095_v47 = vpop.f32.mrf.mxu3 }
 0x234   :  { %4889 = vst [vmem:[#allocation68_spill] sm:$0xff] %v4095_v47 }
 0x235   :  { %2097 = vmatpush.msrb.mxu3 %v1806_v61  ;;  %v1865_v61 = vmax.f32 %v1365_v11, 0.0 }
 0x236   :  { %v4084_v22 = vpop.f32.mrf.mxu0 }
 0x237   :  { %2098 = vmatpush.msrb.mxu3 %v1805_v31  ;;  %v4102_v12 = vpop.f32.mrf.mxu1  ;;  %v1358_v31 = vadd.f32 %v3538_v62, %v3709_v43  ;;  %v3246_v43 = vld [vmem:[%s4815_s0 + $0x318] sm:$0xff] }
 0x238   :  { %4890 = vst [vmem:[#allocation69_spill] sm:$0xff] %v4102_v12 }
 0x239   :  { %2099 = vmatpush.msrb.mxu3 %v1804_v0  ;;  %v4108_v54 = vpop.f32.mrf.mxu2  ;;  %v1353_v0 = vadd.f32 %v3538_v62, %v3683_v27  ;;  %v1862_v11 = vmax.f32 %v1358_v31, 0.0  ;;  %v3272_v27 = vld [vmem:[%s4815_s0 + $0x3e8] sm:$0xff] }
 0x23a   :  { %4891 = vst [vmem:[#allocation70_spill] sm:$0xff] %v4108_v54 }
 0x23b   :  { %2144 = vmatpush.msra.mxu3 %v1867_v5  ;;  %v4114_v5 = vpop.f32.mrf.mxu3 }
 0x23c   :  { %4892 = vst [vmem:[#allocation71_spill] sm:$0xff] %v4114_v5 }
 0x23d   :  { %2145 = vmatpush.msra.mxu3 %v1866_v4  ;;  %v1861_v4 = vmax.f32 %v1355_v21, 0.0  ;;  %v1859_v21 = vmax.f32 %v1350_v28, 0.0 }
 0x23e   :  { %v4106_v59 = vpop.f32.mrf.mxu0  ;;  %1626 = vmatmul.bf16.gmra.mxu2 %v3246_v43  ;;  %1756 = vmatmul.bf16.gmra.mxu3 %v3272_v27  ;;  %v1856_v27 = vmax.f32 %v1343_v9, 0.0  ;;  %v3214_v9 = vld [vmem:[%s4815_s0 + $0x218] sm:$0xff] }
 0x23f   :  { %2146 = vmatpush.msra.mxu3 %v1865_v61  ;;  %v4121_v39 = vpop.f32.mrf.mxu1  ;;  %v1860_v61 = vmax.f32 %v1353_v0, 0.0 }
 0x240   :  { %4893 = vst [vmem:[#allocation72_spill] sm:$0xff] %v4121_v39  ;;  %1461 = vmatmul.bf16.gmra.mxu1 %v3213_v18 }
 0x241   :  { %2147 = vmatpush.msra.mxu3 %v1864_v25  ;;  %1301 = vmatmul.bf16.gmra.mxu0 %v3181_v26  ;;  %v4133_v31 = vpop.f32.mrf.mxu2  ;;  %v1345_v25 = vadd.f32 %v3538_v62, %v3644_v3  ;;  %v3182_v3 = vld [vmem:[%s4815_s0 + $0x118] sm:$0xff] }
 0x242   :  { %4894 = vst [vmem:[#allocation73_spill] sm:$0xff] %v4133_v31 }
 0x243   :  { %2148 = vmatpush.msra.mxu3 %v1863_v45  ;;  %v1858_v45 = vmax.f32 %v1348_v19, 0.0  ;;  %v4139_v0 = vpop.f32.mrf.mxu3  ;;  %v1857_v43 = vmax.f32 %v1345_v25, 0.0  ;;  %v3247_v25 = vld [vmem:[%s4815_s0 + $0x320] sm:$0xff] }
 0x244   :  { %4895 = vst [vmem:[#allocation74_spill] sm:$0xff] %v4139_v0 }
 0x245   :  { %2149 = vmatpush.msra.mxu3 %v1862_v11  ;;  %v1340_v11 = vadd.f32 %v3538_v62, %v3618_v53 }
 0x246   :  { %v4128_v26 = vpop.f32.mrf.mxu0 }
 0x247   :  { %2150 = vmatpush.msra.mxu3 %v1861_v4  ;;  %v4146_v28 = vpop.f32.mrf.mxu1  ;;  %v1338_v4 = vadd.f32 %v3538_v62, %v3603_v48  ;;  %v3273_v48 = vld [vmem:[%s4815_s0 + $0x3f0] sm:$0xff] }
 0x248   :  { %4896 = vst [vmem:[#allocation75_spill] sm:$0xff] %v4146_v28 }
 0x249   :  { %2151 = vmatpush.msra.mxu3 %v1860_v61  ;;  %v4152_v19 = vpop.f32.mrf.mxu2  ;;  %v1855_v61 = vmax.f32 %v1340_v11, 0.0  ;;  %v1854_v53 = vmax.f32 %v1338_v4, 0.0 }
 0x24a   :  { %4897 = vst [vmem:[#allocation76_spill] sm:$0xff] %v4152_v19 }
 0x24b   :  { %2152 = vmatpush.msra.mxu3 %v1859_v21  ;;  %v4154_v18 = vpop.f32.mrf.mxu3 }
 0x24c   :  { %4898 = vst [vmem:[#allocation77_spill] sm:$0xff] %v4154_v18 }
 0x24d   :  { %2153 = vmatpush.msra.mxu3 %v1858_v45 }
 0x24e   :  { %v4150_v58 = vpop.f32.mrf.mxu0  ;;  %1631 = vmatmul.bf16.gmra.mxu2 %v3247_v25  ;;  %1761 = vmatmul.bf16.gmra.mxu3 %v3273_v48  ;;  %v3274_v25 = vld [vmem:[%s4815_s0 + $0x3f8] sm:$0xff] }
 0x24f   :  { %2154 = vmatpush.msra.mxu3 %v1857_v43  ;;  %v4159_v62 = vpop.f32.mrf.mxu1  ;;  %v3183_v43 = vld [vmem:[%s4815_s0 + $0x120] sm:$0xff] }
 0x250   :  { %4899 = vst [vmem:[#allocation78_spill] sm:$0xff] %v4159_v62  ;;  %1466 = vmatmul.bf16.gmra.mxu1 %v3214_v9  ;;  %v3215_v9 = vld [vmem:[%s4815_s0 + $0x220] sm:$0xff] }
 0x251   :  { %2155 = vmatpush.msra.mxu3 %v1856_v27  ;;  %1306 = vmatmul.bf16.gmra.mxu0 %v3182_v3  ;;  %v4169_v45 = vpop.f32.mrf.mxu2 }
 0x252   :  { %4900 = vst [vmem:[#allocation79_spill] sm:$0xff] %v4169_v45 }
 0x253   :  { %2156 = vmatpush.msra.mxu3 %v1855_v61  ;;  %v4171_v11 = vpop.f32.mrf.mxu3 }
 0x254   :  { %4901 = vst [vmem:[#allocation80_spill] sm:$0xff] %v4171_v11 }
 0x255   :  { %2157 = vmatpush.msra.mxu3 %v1854_v53 }
 0x256   :  { %v4164_v21 = vpop.f32.mrf.mxu0 }
 0x257   :  { %v4176_v3 = vpop.f32.mrf.mxu1 }
 0x258   :  { %4902 = vst [vmem:[#allocation81_spill] sm:$0xff] %v4176_v3 }
 0x259   :  { %v4180_v27 = vpop.f32.mrf.mxu2 }
 0x25a   :  { %4903 = vst [vmem:[#allocation82_spill] sm:$0xff] %v4180_v27 }
 0x25b   :  { %v4182_v61 = vpop.f32.mrf.mxu3 }
 0x25c   :  { %4904 = vst [vmem:[#allocation83_spill] sm:$0xff] %v4182_v61  ;;  %v3185_v61 = vld [vmem:[%s4815_s0 + $0x130] sm:$0xff] }
 0x25e   :  { %v4178_v4 = vpop.f32.mrf.mxu0  ;;  %1766 = vmatmul.bf16.gmra.mxu3 %v3274_v25  ;;  %v3216_v25 = vld [vmem:[%s4815_s0 + $0x228] sm:$0xff] }
 0x25f   :  { %v4184_v53 = vpop.f32.mrf.mxu1 }
 0x260   :  { %4905 = vst [vmem:[#allocation84_spill] sm:$0xff] %v4184_v53  ;;  %1471 = vmatmul.bf16.gmra.mxu1 %v3215_v9 }
 0x261   :  { %1311 = vmatmul.bf16.gmra.mxu0 %v3183_v43  ;;  %v4192_v55 = vpop.f32.mrf.mxu2  ;;  %v3184_v43 = vld [vmem:[%s4815_s0 + $0x128] sm:$0xff] }
 0x262   :  { %4906 = vst [vmem:[#allocation85_spill] sm:$0xff] %v4192_v55 }
 0x263   :  { %v4194_v16 = vpop.f32.mrf.mxu3 }
 0x264   :  { %4907 = vst [vmem:[#allocation86_spill] sm:$0xff] %v4194_v16 }
 0x266   :  { %v1274_v48 = vpop.f32.mrf.mxu0 }
 0x267   :  { %v4199_v6 = vpop.f32.mrf.mxu1 }
 0x268   :  { %4908 = vst [vmem:[#allocation87_spill] sm:$0xff] %v4199_v6 }
 0x269   :  { %v4201_v47 = vpop.f32.mrf.mxu2 }
 0x26a   :  { %4909 = vst [vmem:[#allocation88_spill] sm:$0xff] %v4201_v47 }
 0x26b   :  { %v4203_v5 = vpop.f32.mrf.mxu3 }
 0x26c   :  { %4910 = vst [vmem:[#allocation89_spill] sm:$0xff] %v4203_v5 }
 0x26e   :  { %v1277_v35 = vpop.f32.mrf.mxu0 }
 0x26f   :  { %v4205_v0 = vpop.f32.mrf.mxu1 }
 0x270   :  { %1476 = vmatmul.bf16.gmra.mxu1 %v3216_v25  ;;  %v3217_v25 = vld [vmem:[%s4815_s0 + $0x230] sm:$0xff] }
 0x271   :  { %1316 = vmatmul.bf16.gmra.mxu0 %v3184_v43  ;;  %v4210_v9 = vpop.f32.mrf.mxu2 }
 0x272   :  { %4911 = vst [vmem:[#allocation90_spill] sm:$0xff] %v4210_v9 }
 0x273   :  { %v4212_v11 = vpop.f32.mrf.mxu3 }
 0x276   :  { %v1279_v18 = vpop.f32.mrf.mxu0 }
 0x277   :  { %v4217_v16 = vpop.f32.mrf.mxu1 }
 0x279   :  { %v4219_v5 = vpop.f32.mrf.mxu2 }
 0x27a   :  { %4912 = vst [vmem:[#allocation91_spill] sm:$0xff] %v4219_v5 }
 0x27b   :  { %v4221_v15 = vpop.f32.mrf.mxu3 }
 0x27e   :  { %v1282_v43 = vpop.f32.mrf.mxu0 }
 0x27f   :  { %v4223_v20 = vpop.f32.mrf.mxu1 }
 0x280   :  { %1481 = vmatmul.bf16.gmra.mxu1 %v3217_v25  ;;  %v4246_v25 = vld [vmem:[%s4814_s3] ss:$0 sm:$0xff] }
 0x281   :  { %1321 = vmatmul.bf16.gmra.mxu0 %v3185_v61  ;;  %v4230_v23 = vpop.f32.mrf.mxu2  ;;  %v3186_v61 = vld [vmem:[%s4815_s0 + $0x138] sm:$0xff]  ;;  %v1283_v9 = vadd.f32 %v4246_v25, %v1282_v43  ;;  %v1280_v5 = vadd.f32 %v4246_v25, %v1279_v18  ;;  %v1270_v43 = vadd.f32 %v4246_v25, %v4164_v21  ;;  %v1263_v21 = vadd.f32 %v4246_v25, %v4106_v59 }
 0x282   :  { %4913 = vst [vmem:[#allocation92_spill] sm:$0xff] %v4230_v23 }
 0x283   :  { %v4228_v30 = vpop.f32.mrf.mxu3  ;;  %v1832_v23 = vmax.f32 %v1283_v9, 0.0  ;;  %v1827_v9 = vmax.f32 %v1270_v43, 0.0 }
 0x286   :  { %v1284_v52 = vpop.f32.mrf.mxu0 }
 0x287   :  { %v4235_v54 = vpop.f32.mrf.mxu1  ;;  %v1285_v47 = vadd.f32 %v4246_v25, %v1284_v52 }
 0x289   :  { %v4241_v27 = vpop.f32.mrf.mxu2  ;;  %v1833_v39 = vmax.f32 %v1285_v47, 0.0  ;;  %v1831_v47 = vmax.f32 %v1280_v5, 0.0 }
 0x28a   :  { %4914 = vst [vmem:[#allocation93_spill] sm:$0xff] %v4241_v27 }
 0x28b   :  { %v4237_v19 = vpop.f32.mrf.mxu3 }
 0x28e   :  { %v1287_v31 = vpop.f32.mrf.mxu0 }
 0x28f   :  { %v4239_v45 = vpop.f32.mrf.mxu1  ;;  %v1288_v55 = vadd.f32 %v4246_v25, %v1287_v31 }
 0x291   :  { %1326 = vmatmul.bf16.gmra.mxu0 %v3186_v61  ;;  %v2028_v61 = vld [vmem:[%s4816_s1] sm:$0xff]  ;;  %v1834_v12 = vmax.f32 %v1288_v55, 0.0  ;;  %v4266_v55 = vpop.f32.mrf.mxu2 }
 0x292   :  { %2060 = vmatmul.f32.vlgmr.msrb.gmra.mxu1 %v2028_v61  ;;  %v1278_v61 = vadd.f32 %v4246_v25, %v1277_v35 }
 0x294   :  { %v1830_v18 = vmax.f32 %v1278_v61, 0.0 }
 0x296   :  { %v1289_v56 = vpop.f32.mrf.mxu0 }
 0x297   :  { %v1290_v14 = vadd.f32 %v4246_v25, %v1289_v56  ;;  %v3187_v56 = vld [vmem:[%s4815_s0 + $0x140] sm:$0xff]  ;;  %v4259_v31 = vpop.f32.mrf.mxu1 }
 0x299   :  { %v1835_v42 = vmax.f32 %v1290_v14, 0.0  ;;  %v4263_v14 = vpop.f32.mrf.mxu3 }
 0x29b   :  { %2104 = vmatpush.msra.mxu1 %v1835_v42  ;;  %v1275_v42 = vadd.f32 %v4246_v25, %v1274_v48  ;;  %v1268_v48 = vadd.f32 %v4246_v25, %v4150_v58 }
 0x29d   :  { %2105 = vmatpush.msra.mxu1 %v1834_v12  ;;  %v1273_v12 = vadd.f32 %v4246_v25, %v4178_v4  ;;  %v1829_v28 = vmax.f32 %v1275_v42, 0.0  ;;  %v1265_v4 = vadd.f32 %v4246_v25, %v4128_v26  ;;  %v1826_v61 = vmax.f32 %v1268_v48, 0.0 }
 0x29e   :  { %v4261_v52 = vpop.f32.mrf.mxu0  ;;  %v1260_v42 = vadd.f32 %v4246_v25, %v4084_v22  ;;  %v1824_v26 = vmax.f32 %v1263_v21, 0.0  ;;  %v1253_v22 = vadd.f32 %v4246_v25, %v4017_v44 }
 0x29f   :  { %2106 = vmatpush.msra.mxu1 %v1833_v39  ;;  %v4273_v35 = vpop.f32.mrf.mxu1  ;;  %v1828_v5 = vmax.f32 %v1273_v12, 0.0  ;;  %v1825_v58 = vmax.f32 %v1265_v4, 0.0 }
 0x2a0   :  { %4915 = vst [vmem:[#allocation94_spill] sm:$0xff] %v4273_v35  ;;  %v1823_v59 = vmax.f32 %v1260_v42, 0.0  ;;  %v1820_v21 = vmax.f32 %v1253_v22, 0.0  ;;  %v2031_v42 = vld [vmem:[%s4816_s1 + $0x18] sm:$0xff]  ;;  %v4929_v35 = vld [vmem:[#allocation19_spill] sm:$0xff] }
 0x2a1   :  { %1331 = vmatmul.bf16.gmra.mxu0 %v3187_v56  ;;  %2107 = vmatpush.msra.mxu1 %v1832_v23  ;;  %v4279_v23 = vpop.f32.mrf.mxu3  ;;  %v4283_v56 = vpop.f32.mrf.mxu2 }
 0x2a3   :  { %2108 = vmatpush.msra.mxu1 %v1831_v47  ;;  %v1258_v47 = vadd.f32 %v4246_v25, %v4060_v63  ;;  %v1410_v63 = vadd.f32 %v4246_v25, %v4015_v29  ;;  %v1403_v29 = vadd.f32 %v4246_v25, %v3971_v7  ;;  %v1395_v7 = vadd.f32 %v4246_v25, %v3938_v2 }
 0x2a5   :  { %2109 = vmatpush.msra.mxu1 %v1830_v18  ;;  %v1255_v18 = vadd.f32 %v4246_v25, %v4038_v24  ;;  %v1822_v48 = vmax.f32 %v1258_v47, 0.0  ;;  %v1883_v44 = vmax.f32 %v1410_v63, 0.0  ;;  %v1880_v22 = vmax.f32 %v1403_v29, 0.0 }
 0x2a6   :  { %v4275_v39 = vpop.f32.mrf.mxu0 }
 0x2a7   :  { %2110 = vmatpush.msra.mxu1 %v1829_v28  ;;  %v4293_v12 = vpop.f32.mrf.mxu1  ;;  %v1821_v4 = vmax.f32 %v1255_v18, 0.0 }
 0x2a8   :  { %4916 = vst [vmem:[#allocation95_spill] sm:$0xff] %v4293_v12 }
 0x2a9   :  { %2111 = vmatpush.msra.mxu1 %v1828_v5  ;;  %v4297_v43 = vpop.f32.mrf.mxu3  ;;  %v4301_v5 = vpop.f32.mrf.mxu2 }
 0x2ab   :  { %2112 = vmatpush.msra.mxu1 %v1827_v9  ;;  %v1408_v9 = vadd.f32 %v4246_v25, %v3995_v41  ;;  %v1400_v41 = vadd.f32 %v4246_v25, %v3962_v1  ;;  %v1393_v1 = vadd.f32 %v4246_v25, %v3921_v17  ;;  %v1385_v17 = vadd.f32 %v4246_v25, %v3882_v50 }
 0x2ac   :  { %v1375_v50 = vadd.f32 %v4246_v25, %v3820_v57 }
 0x2ad   :  { %2113 = vmatpush.msra.mxu1 %v1826_v61  ;;  %v1405_v61 = vadd.f32 %v4246_v25, %v3986_v37  ;;  %v1882_v47 = vmax.f32 %v1408_v9, 0.0  ;;  %v1879_v63 = vmax.f32 %v1400_v41, 0.0 }
 0x2ae   :  { %v4289_v28 = vpop.f32.mrf.mxu0 }
 0x2af   :  { %2114 = vmatpush.msra.mxu1 %v1825_v58  ;;  %v4314_v58 = vpop.f32.mrf.mxu1 }
 0x2b0   :  { %4917 = vst [vmem:[#allocation96_spill] sm:$0xff] %v4314_v58 }
 0x2b1   :  { %2115 = vmatpush.msra.mxu1 %v1824_v26  ;;  %v1881_v26 = vmax.f32 %v1405_v61, 0.0  ;;  %v4320_v37 = vpop.f32.mrf.mxu3  ;;  %v4322_v18 = vpop.f32.mrf.mxu2  ;;  %v1388_v61 = vadd.f32 %v4246_v25, %v3893_v32  ;;  %v1380_v32 = vadd.f32 %v4246_v25, %v3854_v49  ;;  %v1373_v49 = vadd.f32 %v4246_v25, %v3795_v13  ;;  %v2034_v13 = vld [vmem:[%s4816_s1 + $0x30] sm:$0xff] }
 0x2b3   :  { %2116 = vmatpush.msra.mxu1 %v1823_v59  ;;  %v1398_v59 = vadd.f32 %v4246_v25, %v3947_v60  ;;  %v1877_v60 = vmax.f32 %v1395_v7, 0.0  ;;  %v1874_v41 = vmax.f32 %v1388_v61, 0.0  ;;  %v1528_v61 = vadd.f32 %v4246_v25, %v3741_v10 }
 0x2b4   :  { %v1868_v57 = vmax.f32 %v1373_v49, 0.0 }
 0x2b5   :  { %2117 = vmatpush.msra.mxu1 %v1822_v48 }
 0x2b6   :  { %v4307_v24 = vpop.f32.mrf.mxu0 }
 0x2b7   :  { %2118 = vmatpush.msra.mxu1 %v1821_v4  ;;  %v1878_v4 = vmax.f32 %v1398_v59, 0.0  ;;  %v4332_v9 = vpop.f32.mrf.mxu1 }
 0x2b8   :  { %4918 = vst [vmem:[#allocation97_spill] sm:$0xff] %v4332_v9 }
 0x2b9   :  { %2119 = vmatpush.msra.mxu1 %v1820_v21  ;;  %v1390_v21 = vadd.f32 %v4246_v25, %v3910_v8  ;;  %v4340_v2 = vpop.f32.mrf.mxu3  ;;  %v4342_v29 = vpop.f32.mrf.mxu2  ;;  %v1383_v8 = vadd.f32 %v4246_v25, %v3865_v38  ;;  %v1871_v38 = vmax.f32 %v1380_v32, 0.0  ;;  %v1520_v32 = vadd.f32 %v4246_v25, %v3702_v34 }
 0x2ba   :  { %2120 = vmatmul.f32.vlgmr.msra.gmra.mxu1 %v2031_v42 }
 0x2bb   :  { %2164 = vmatpush.msrb.mxu1 %v1883_v44  ;;  %v1876_v44 = vmax.f32 %v1393_v1, 0.0  ;;  %v1872_v7 = vmax.f32 %v1383_v8, 0.0  ;;  %v1927_v49 = vmax.f32 %v1520_v32, 0.0 }
 0x2bd   :  { %2165 = vmatpush.msrb.mxu1 %v1882_v47  ;;  %v1875_v47 = vmax.f32 %v1390_v21, 0.0 }
 0x2be   :  { %v4326_v48 = vpop.f32.mrf.mxu0 }
 0x2bf   :  { %2166 = vmatpush.msrb.mxu1 %v1881_v26  ;;  %v1873_v26 = vmax.f32 %v1385_v17, 0.0  ;;  %v4350_v59 = vpop.f32.mrf.mxu1  ;;  %v1525_v17 = vadd.f32 %v4246_v25, %v3726_v51 }
 0x2c1   :  { %2167 = vmatpush.msrb.mxu1 %v1880_v22  ;;  %v1378_v22 = vadd.f32 %v4246_v25, %v3837_v40  ;;  %v4358_v1 = vpop.f32.mrf.mxu3  ;;  %v1530_v40 = vadd.f32 %v4246_v25, %v3750_v33  ;;  %v1523_v33 = vadd.f32 %v4246_v25, %v3717_v46  ;;  %v1929_v51 = vmax.f32 %v1525_v17, 0.0  ;;  %v4919_v46 = vld [vmem:[#allocation16_spill] sm:$0xff] }
 0x2c3   :  { %2168 = vmatpush.msrb.mxu1 %v1879_v63  ;;  %v1870_v21 = vmax.f32 %v1378_v22, 0.0  ;;  %v1518_v22 = vadd.f32 %v4246_v25, %v3693_v36 }
 0x2c5   :  { %2169 = vmatpush.msrb.mxu1 %v1878_v4  ;;  %v4360_v4 = vpop.f32.mrf.mxu2  ;;  %v1926_v34 = vmax.f32 %v1518_v22, 0.0 }
 0x2c6   :  { %v4338_v42 = vpop.f32.mrf.mxu0 }
 0x2c7   :  { %2170 = vmatpush.msrb.mxu1 %v1877_v60  ;;  %v1869_v60 = vmax.f32 %v1375_v50, 0.0  ;;  %v4372_v8 = vpop.f32.mrf.mxu1 }
 0x2c9   :  { %2171 = vmatpush.msrb.mxu1 %v1876_v44  ;;  %v4379_v10 = vpop.f32.mrf.mxu3 }
 0x2cb   :  { %2172 = vmatpush.msrb.mxu1 %v1875_v47  ;;  %v1931_v47 = vmax.f32 %v1530_v40, 0.0 }
 0x2cd   :  { %2173 = vmatpush.msrb.mxu1 %v1874_v41  ;;  %v1930_v41 = vmax.f32 %v1528_v61, 0.0  ;;  %v4921_v61 = vld [vmem:[#allocation12_spill] sm:$0xff] }
 0x2ce   :  { %v4354_v63 = vpop.f32.mrf.mxu0 }
 0x2cf   :  { %2174 = vmatpush.msrb.mxu1 %v1873_v26  ;;  %v4383_v26 = vpop.f32.mrf.mxu2 }
 0x2d1   :  { %2175 = vmatpush.msrb.mxu1 %v1872_v7  ;;  %v1928_v7 = vmax.f32 %v1523_v33, 0.0  ;;  %v4397_v17 = vpop.f32.mrf.mxu3 }
 0x2d3   :  { %2176 = vmatpush.msrb.mxu1 %v1871_v38  ;;  %v1515_v38 = vadd.f32 %v4246_v25, %v4919_v46  ;;  %v4924_v46 = vld [vmem:[#allocation8_spill] sm:$0xff] }
 0x2d5   :  { %2177 = vmatpush.msrb.mxu1 %v1870_v21  ;;  %v4920_v21 = vld [vmem:[#allocation14_spill] sm:$0xff]  ;;  %v1925_v36 = vmax.f32 %v1515_v38, 0.0 }
 0x2d6   :  { %v4368_v44 = vpop.f32.mrf.mxu0  ;;  %v1513_v40 = vadd.f32 %v4246_v25, %v4920_v21  ;;  %v4925_v21 = vld [vmem:[#allocation7_spill] sm:$0xff] }
 0x2d7   :  { %2178 = vmatpush.msrb.mxu1 %v1869_v60  ;;  %v4393_v60 = vpop.f32.mrf.mxu1 }
 0x2d8   :  { %v1924_v33 = vmax.f32 %v1513_v40, 0.0 }
 0x2d9   :  { %2179 = vmatpush.msrb.mxu1 %v1868_v57  ;;  %v1510_v57 = vadd.f32 %v4246_v25, %v4921_v61 }
 0x2da   :  { %2180 = vmatmul.f32.vlgmr.msrb.gmra.mxu1 %v2034_v13 }
 0x2db   :  { %2224 = vmatpush.msra.mxu1 %v1931_v47  ;;  %v4922_v47 = vld [vmem:[#allocation10_spill] sm:$0xff] }
 0x2dc   :  { %v1508_v13 = vadd.f32 %v4246_v25, %v4922_v47 }
 0x2dd   :  { %2225 = vmatpush.msra.mxu1 %v1930_v41  ;;  %v1629_v41 = vpop.f32.mrf.mxu2 }
 0x2de   :  { %v4387_v50 = vpop.f32.mrf.mxu0  ;;  %v1922_v38 = vmax.f32 %v1508_v13, 0.0 }
 0x2df   :  { %2226 = vmatpush.msra.mxu1 %v1929_v51  ;;  %v4923_v51 = vld [vmem:[#allocation9_spill] sm:$0xff]  ;;  %v4409_v40 = vpop.f32.mrf.mxu1 }
 0x2e0   :  { %v1505_v22 = vadd.f32 %v4246_v25, %v4923_v51 }
 0x2e1   :  { %2227 = vmatpush.msra.mxu1 %v1928_v7  ;;  %v1923_v7 = vmax.f32 %v1510_v57, 0.0  ;;  %v4415_v57 = vpop.f32.mrf.mxu3 }
 0x2e2   :  { %v1921_v61 = vmax.f32 %v1505_v22, 0.0 }
 0x2e3   :  { %2228 = vmatpush.msra.mxu1 %v1927_v49  ;;  %v1503_v49 = vadd.f32 %v4246_v25, %v4924_v46 }
 0x2e5   :  { %2229 = vmatpush.msra.mxu1 %v1926_v34  ;;  %v1500_v34 = vadd.f32 %v4246_v25, %v4925_v21  ;;  %v1920_v27 = vmax.f32 %v1503_v49, 0.0  ;;  %v1632_v46 = vpop.f32.mrf.mxu2  ;;  %v4928_v21 = vld [vmem:[#allocation4_spill] sm:$0xff] }
 0x2e6   :  { %v4401_v32 = vpop.f32.mrf.mxu0  ;;  %v1493_v22 = vadd.f32 %v4246_v25, %v4928_v21 }
 0x2e7   :  { %2230 = vmatpush.msra.mxu1 %v1925_v36  ;;  %v4926_v36 = vld [vmem:[#allocation6_spill] sm:$0xff]  ;;  %v4425_v3 = vpop.f32.mrf.mxu1 }
 0x2e8   :  { %v1498_v47 = vadd.f32 %v4246_v25, %v4926_v36  ;;  %v1650_v36 = vadd.f32 %v4246_v25, %v4929_v35  ;;  %v1916_v12 = vmax.f32 %v1493_v22, 0.0  ;;  %v2037_v35 = vld [vmem:[%s4816_s1 + $0x48] sm:$0xff] }
 0x2e9   :  { %2231 = vmatpush.msra.mxu1 %v1924_v33  ;;  %v4927_v33 = vld [vmem:[#allocation5_spill] sm:$0xff]  ;;  %v1764_v21 = vpop.f32.mrf.mxu3 }
 0x2ea   :  { %v1495_v13 = vadd.f32 %v4246_v25, %v4927_v33  ;;  %v1979_v33 = vmax.f32 %v1650_v36, 0.0  ;;  %v4934_v36 = vld [vmem:[#allocation11_spill] sm:$0xff] }
 0x2eb   :  { %2232 = vmatpush.msra.mxu1 %v1923_v7  ;;  %v1919_v7 = vmax.f32 %v1500_v34, 0.0  ;;  %v4931_v34 = vld [vmem:[#allocation17_spill] sm:$0xff] }
 0x2ec   :  { %v1917_v49 = vmax.f32 %v1495_v13, 0.0 }
 0x2ed   :  { %2233 = vmatpush.msra.mxu1 %v1922_v38  ;;  %v1918_v38 = vmax.f32 %v1498_v47, 0.0  ;;  %v4932_v47 = vld [vmem:[#allocation15_spill] sm:$0xff]  ;;  %v1634_v22 = vpop.f32.mrf.mxu2 }
 0x2ee   :  { %v4413_v51 = vpop.f32.mrf.mxu0  ;;  %v1643_v13 = vadd.f32 %v4246_v25, %v4932_v47  ;;  %v1635_v53 = vadd.f32 %v4246_v25, %v1634_v22  ;;  %v2030_v47 = vld [vmem:[%s4816_s1 + $0x10] sm:$0xff]  ;;  %v1628_v22 = vadd.f32 %v4246_v25, %v4383_v26  ;;  %v1618_v26 = vadd.f32 %v4246_v25, %v4301_v5 }
 0x2ef   :  { %2234 = vmatpush.msra.mxu1 %v1921_v61  ;;  %v4930_v61 = vld [vmem:[#allocation18_spill] sm:$0xff]  ;;  %2100 = vmatmul.f32.vlgmr.msrb.gmra.mxu3 %v2030_v47 }
 0x2f0   :  { %v1648_v62 = vadd.f32 %v4246_v25, %v4930_v61  ;;  %v1966_v47 = vmax.f32 %v1618_v26, 0.0 }
 0x2f1   :  { %2235 = vmatpush.msra.mxu1 %v1920_v27  ;;  %v1645_v27 = vadd.f32 %v4246_v25, %v4931_v34  ;;  %v1976_v34 = vmax.f32 %v1643_v13, 0.0  ;;  %v1630_v13 = vadd.f32 %v4246_v25, %v1629_v41 }
 0x2f3   :  { %2236 = vmatpush.msra.mxu1 %v1919_v7  ;;  %v1978_v7 = vmax.f32 %v1648_v62, 0.0  ;;  %v1977_v61 = vmax.f32 %v1645_v27, 0.0  ;;  %v2029_v62 = vld [vmem:[%s4816_s1 + $0x8] sm:$0xff] }
 0x2f4   :  { %2080 = vmatmul.f32.vlgmr.msrb.gmra.mxu2 %v2029_v62 }
 0x2f5   :  { %2237 = vmatpush.msra.mxu1 %v1918_v38  ;;  %v4933_v38 = vld [vmem:[#allocation13_spill] sm:$0xff] }
 0x2f6   :  { %v4429_v58 = vpop.f32.mrf.mxu0 }
 0x2f7   :  { %2238 = vmatpush.msra.mxu1 %v1917_v49  ;;  %v1640_v49 = vadd.f32 %v4246_v25, %v4933_v38 }
 0x2f9   :  { %2239 = vmatpush.msra.mxu1 %v1916_v12  ;;  %v1638_v12 = vadd.f32 %v4246_v25, %v4934_v36  ;;  %v1975_v9 = vmax.f32 %v1640_v49, 0.0  ;;  %v1767_v49 = vpop.f32.mrf.mxu3  ;;  %v1623_v36 = vadd.f32 %v4246_v25, %v4342_v29 }
 0x2fa   :  { %2240 = vmatmul.f32.vlgmr.msra.gmra.mxu1 %v2037_v35  ;;  %v4445_v35 = vpop.f32.mrf.mxu1  ;;  %v1768_v5 = vadd.f32 %v4246_v25, %v1767_v49  ;;  %v1760_v49 = vadd.f32 %v4246_v25, %v4397_v17  ;;  %v1320_v17 = vadd.f32 %v4246_v25, %v4429_v58  ;;  %v1315_v58 = vadd.f32 %v4246_v25, %v4401_v32 }
 0x2fb   :  { %2284 = vmatpush.msrb.mxu1 %v1979_v33  ;;  %v1633_v33 = vadd.f32 %v4246_v25, %v1632_v46  ;;  %v1974_v27 = vmax.f32 %v1638_v12, 0.0  ;;  %v1625_v46 = vadd.f32 %v4246_v25, %v4360_v4  ;;  %v1970_v12 = vmax.f32 %v1628_v22, 0.0 }
 0x2fc   :  { %v1968_v62 = vmax.f32 %v1623_v36, 0.0  ;;  %v1615_v4 = vadd.f32 %v4246_v25, %v4283_v56  ;;  %v1765_v56 = vadd.f32 %v4246_v25, %v1764_v21  ;;  %v1310_v32 = vadd.f32 %v4246_v25, %v4368_v44 }
 0x2fd   :  { %2285 = vmatpush.msrb.mxu1 %v1978_v7  ;;  %v1973_v7 = vmax.f32 %v1635_v53, 0.0  ;;  %v1972_v38 = vmax.f32 %v1633_v33, 0.0  ;;  %v1620_v53 = vadd.f32 %v4246_v25, %v4322_v18  ;;  %v1969_v41 = vmax.f32 %v1625_v46, 0.0 }
 0x2fe   :  { %v1322_v6 = vpop.f32.mrf.mxu0  ;;  %v1743_v44 = vadd.f32 %v4246_v25, %v4263_v14  ;;  %v1303_v14 = vadd.f32 %v4246_v25, %v4326_v48 }
 0x2ff   :  { %2286 = vmatpush.msrb.mxu1 %v1977_v61  ;;  %v1971_v61 = vmax.f32 %v1630_v13, 0.0  ;;  %v1967_v33 = vmax.f32 %v1620_v53, 0.0 }
 0x301   :  { %2287 = vmatpush.msrb.mxu1 %v1976_v34  ;;  %v1769_v29 = vpop.f32.mrf.mxu3 }
 0x302   :  { %v4459_v34 = vpop.f32.mrf.mxu1  ;;  %v1770_v13 = vadd.f32 %v4246_v25, %v1769_v29  ;;  %v1755_v29 = vadd.f32 %v4246_v25, %v4358_v1  ;;  %v1750_v1 = vadd.f32 %v4246_v25, %v4320_v37  ;;  %v1745_v37 = vadd.f32 %v4246_v25, %v4279_v23  ;;  %v4935_v23 = vld [vmem:[#allocation3_spill] sm:$0xff] }
 0x303   :  { %2288 = vmatpush.msrb.mxu1 %v1975_v9 }
 0x304   :  { %v2027_v46 = vmax.f32 %v1770_v13, 0.0 }
 0x305   :  { %2289 = vmatpush.msrb.mxu1 %v1974_v27  ;;  %v1613_v27 = vadd.f32 %v4246_v25, %v4266_v55  ;;  %v1763_v55 = vadd.f32 %v4246_v25, %v4415_v57  ;;  %v1323_v57 = vadd.f32 %v4246_v25, %v1322_v6  ;;  %v1318_v6 = vadd.f32 %v4246_v25, %v4413_v51 }
 0x306   :  { %v1324_v9 = vpop.f32.mrf.mxu0  ;;  %v1313_v51 = vadd.f32 %v4246_v25, %v4387_v50  ;;  %v1308_v50 = vadd.f32 %v4246_v25, %v4354_v63  ;;  %v4936_v63 = vld [vmem:[#allocation2_spill] sm:$0xff] }
 0x307   :  { %2290 = vmatpush.msrb.mxu1 %v1973_v7  ;;  %v1965_v7 = vmax.f32 %v1615_v4, 0.0  ;;  %v1964_v22 = vmax.f32 %v1613_v27, 0.0  ;;  %v1325_v26 = vadd.f32 %v4246_v25, %v1324_v9  ;;  %v2024_v4 = vmax.f32 %v1763_v55, 0.0 }
 0x308   :  { %v2023_v27 = vmax.f32 %v1760_v49, 0.0  ;;  %v1753_v9 = vadd.f32 %v4246_v25, %v4340_v2  ;;  %v1748_v2 = vadd.f32 %v4246_v25, %v4297_v43  ;;  %v2019_v55 = vmax.f32 %v1750_v1, 0.0 }
 0x309   :  { %2291 = vmatpush.msrb.mxu1 %v1972_v38  ;;  %v1735_v1 = vadd.f32 %v4246_v25, %v4221_v15  ;;  %v1295_v15 = vadd.f32 %v4246_v25, %v4275_v39  ;;  %v1475_v39 = vadd.f32 %v4246_v25, %v4445_v35 }
 0x30a   :  { %v4469_v38 = vpop.f32.mrf.mxu1 }
 0x30b   :  { %2292 = vmatpush.msrb.mxu1 %v1971_v61  ;;  %v2026_v61 = vmax.f32 %v1768_v5, 0.0  ;;  %v2021_v5 = vmax.f32 %v1755_v29, 0.0  ;;  %v1488_v29 = vadd.f32 %v4246_v25, %v4936_v63  ;;  %v4939_v63 = vld [vmem:[#allocation84_spill] sm:$0xff] }
 0x30d   :  { %2293 = vmatpush.msrb.mxu1 %v1970_v12  ;;  %v1914_v48 = vmax.f32 %v1488_v29, 0.0 }
 0x30e   :  { %v1327_v18 = vpop.f32.mrf.mxu0 }
 0x30f   :  { %2294 = vmatpush.msrb.mxu1 %v1969_v41  ;;  %v1328_v12 = vadd.f32 %v4246_v25, %v1327_v18  ;;  %v2025_v41 = vmax.f32 %v1765_v56, 0.0  ;;  %v2020_v56 = vmax.f32 %v1753_v9, 0.0  ;;  %v1738_v9 = vadd.f32 %v4246_v25, %v4228_v30 }
 0x311   :  { %2295 = vmatpush.msrb.mxu1 %v1968_v62  ;;  %v1758_v62 = vadd.f32 %v4246_v25, %v4379_v10 }
 0x312   :  { %v1482_v10 = vpop.f32.mrf.mxu1 }
 0x313   :  { %2296 = vmatpush.msrb.mxu1 %v1967_v33  ;;  %v1850_v33 = vmax.f32 %v1328_v12, 0.0  ;;  %v2022_v18 = vmax.f32 %v1758_v62, 0.0  ;;  %v1305_v62 = vadd.f32 %v4246_v25, %v4338_v42 }
 0x315   :  { %2297 = vmatpush.msrb.mxu1 %v1966_v47  ;;  %v1849_v47 = vmax.f32 %v1325_v26, 0.0  ;;  %v1490_v26 = vadd.f32 %v4246_v25, %v4935_v23  ;;  %v1465_v23 = vadd.f32 %v4246_v25, %v4372_v8 }
 0x316   :  { %v1329_v36 = vpop.f32.mrf.mxu0 }
 0x317   :  { %2298 = vmatpush.msrb.mxu1 %v1965_v7  ;;  %v1330_v53 = vadd.f32 %v4246_v25, %v1329_v36  ;;  %v1848_v7 = vmax.f32 %v1323_v57, 0.0  ;;  %v2018_v36 = vmax.f32 %v1748_v2, 0.0  ;;  %v1915_v42 = vmax.f32 %v1490_v26, 0.0 }
 0x318   :  { %v1480_v2 = vadd.f32 %v4246_v25, %v4469_v38  ;;  %v1450_v38 = vadd.f32 %v4246_v25, %v4259_v31  ;;  %v1445_v31 = vadd.f32 %v4246_v25, %v4235_v54  ;;  %v1440_v54 = vadd.f32 %v4246_v25, %v4217_v16 }
 0x319   :  { %2299 = vmatpush.msrb.mxu1 %v1964_v22  ;;  %v1851_v21 = vmax.f32 %v1330_v53, 0.0  ;;  %v1847_v22 = vmax.f32 %v1320_v17, 0.0  ;;  %v1844_v53 = vmax.f32 %v1313_v51, 0.0 }
 0x31a   :  { %v1899_v35 = vmax.f32 %v1450_v38, 0.0 }
 0x31b   :  { %2344 = vmatpush.msra.mxu1 %v2027_v46  ;;  %2124 = vmatpush.msra.mxu2 %v1851_v21  ;;  %v1846_v46 = vmax.f32 %v1318_v6, 0.0  ;;  %v2017_v21 = vmax.f32 %v1745_v37, 0.0  ;;  %v2033_v6 = vld [vmem:[%s4816_s1 + $0x28] sm:$0xff] }
 0x31d   :  { %2345 = vmatpush.msra.mxu1 %v2026_v61  ;;  %2125 = vmatpush.msra.mxu2 %v1850_v33  ;;  %v1845_v61 = vmax.f32 %v1315_v58, 0.0  ;;  %v1840_v58 = vmax.f32 %v1303_v14, 0.0  ;;  %v4941_v14 = vld [vmem:[#allocation81_spill] sm:$0xff] }
 0x31e   :  { %v1332_v13 = vpop.f32.mrf.mxu0 }
 0x31f   :  { %2346 = vmatpush.msra.mxu1 %v2025_v41  ;;  %2126 = vmatpush.msra.mxu2 %v1849_v47  ;;  %v1333_v43 = vadd.f32 %v4246_v25, %v1332_v13  ;;  %v1484_v41 = vpop.f32.mrf.mxu1  ;;  %v1842_v47 = vmax.f32 %v1308_v50, 0.0  ;;  %v1483_v13 = vadd.f32 %v4246_v25, %v1482_v10  ;;  %v1298_v10 = vadd.f32 %v4246_v25, %v4289_v28 }
 0x320   :  { %v1485_v17 = vadd.f32 %v4246_v25, %v1484_v41  ;;  %v1478_v28 = vadd.f32 %v4246_v25, %v4459_v34  ;;  %v1448_v34 = vadd.f32 %v4246_v25, %v4239_v45  ;;  %v1909_v50 = vmax.f32 %v1475_v39, 0.0  ;;  %v2032_v45 = vld [vmem:[%s4816_s1 + $0x20] sm:$0xff] }
 0x321   :  { %2347 = vmatpush.msra.mxu1 %v2024_v4  ;;  %2127 = vmatpush.msra.mxu2 %v1848_v7  ;;  %v1843_v4 = vmax.f32 %v1310_v32, 0.0  ;;  %v1852_v57 = vmax.f32 %v1333_v43, 0.0  ;;  %v1841_v7 = vmax.f32 %v1305_v62, 0.0  ;;  %v1911_v32 = vmax.f32 %v1480_v2, 0.0  ;;  %v4937_v62 = vld [vmem:[#allocation87_spill] sm:$0xff]  ;;  %v2036_v39 = vld [vmem:[%s4816_s1 + $0x40] sm:$0xff] }
 0x322   :  { %v1913_v30 = vmax.f32 %v1485_v17, 0.0  ;;  %v1435_v16 = vadd.f32 %v4246_v25, %v4937_v62  ;;  %v4958_v62 = vld [vmem:[#allocation82_spill] sm:$0xff] }
 0x323   :  { %2348 = vmatpush.msra.mxu1 %v2023_v27  ;;  %2128 = vmatpush.msra.mxu2 %v1847_v22  ;;  %v1740_v27 = vadd.f32 %v4246_v25, %v4237_v19  ;;  %v1300_v19 = vadd.f32 %v4246_v25, %v4307_v24  ;;  %v1733_v24 = vadd.f32 %v4246_v25, %v4212_v11  ;;  %v2014_v22 = vmax.f32 %v1738_v9, 0.0  ;;  %v4942_v9 = vld [vmem:[#allocation95_spill] sm:$0xff] }
 0x324   :  { %v1293_v11 = vadd.f32 %v4246_v25, %v4261_v52  ;;  %v1473_v52 = vadd.f32 %v4246_v25, %v4425_v3  ;;  %v1443_v3 = vadd.f32 %v4246_v25, %v4223_v20  ;;  %v1438_v20 = vadd.f32 %v4246_v25, %v4205_v0 }
 0x325   :  { %2349 = vmatpush.msra.mxu1 %v2022_v18  ;;  %2129 = vmatpush.msra.mxu2 %v1846_v46  ;;  %v2016_v18 = vmax.f32 %v1743_v44, 0.0  ;;  %v1839_v51 = vmax.f32 %v1300_v19, 0.0  ;;  %v2013_v46 = vmax.f32 %v1735_v1, 0.0  ;;  %v2012_v37 = vmax.f32 %v1733_v24, 0.0 }
 0x326   :  { %v1334_v12 = vpop.f32.mrf.mxu0  ;;  %v1836_v43 = vmax.f32 %v1293_v11, 0.0  ;;  %v1908_v41 = vmax.f32 %v1473_v52, 0.0  ;;  %v1896_v44 = vmax.f32 %v1443_v3, 0.0  ;;  %v1433_v0 = vadd.f32 %v4246_v25, %v4939_v63  ;;  %v4951_v52 = vld [vmem:[#allocation90_spill] sm:$0xff]  ;;  %v4960_v63 = vld [vmem:[#allocation79_spill] sm:$0xff] }
 0x327   :  { %2350 = vmatpush.msra.mxu1 %v2021_v5  ;;  %v1335_v49 = vadd.f32 %v4246_v25, %v1334_v12  ;;  %2130 = vmatpush.msra.mxu2 %v1845_v61  ;;  %v2015_v5 = vmax.f32 %v1740_v27, 0.0  ;;  %v1837_v61 = vmax.f32 %v1295_v15, 0.0  ;;  %v1470_v12 = vadd.f32 %v4246_v25, %v4409_v40  ;;  %v4940_v27 = vld [vmem:[#allocation96_spill] sm:$0xff] }
 0x328   :  { %v1897_v40 = vmax.f32 %v1445_v31, 0.0  ;;  %v1894_v29 = vmax.f32 %v1438_v20, 0.0  ;;  %v4952_v31 = vld [vmem:[#allocation66_spill] sm:$0xff] }
 0x329   :  { %2351 = vmatpush.msra.mxu1 %v2020_v56  ;;  %v1853_v33 = vmax.f32 %v1335_v49, 0.0  ;;  %2131 = vmatpush.msra.mxu2 %v1844_v53  ;;  %v1912_v56 = vmax.f32 %v1483_v13, 0.0  ;;  %v1898_v53 = vmax.f32 %v1448_v34, 0.0  ;;  %v1468_v49 = vadd.f32 %v4246_v25, %v4393_v60 }
 0x32a   :  { %v1907_v26 = vmax.f32 %v1470_v12, 0.0  ;;  %v1463_v60 = vadd.f32 %v4246_v25, %v4350_v59  ;;  %v1458_v59 = vadd.f32 %v4246_v25, %v4940_v27 }
 0x32b   :  { %2352 = vmatpush.msra.mxu1 %v2019_v55  ;;  %2132 = vmatpush.msra.mxu2 %v1843_v4  ;;  %v1838_v55 = vmax.f32 %v1298_v10, 0.0  ;;  %v1895_v4 = vmax.f32 %v1440_v54, 0.0  ;;  %v4955_v54 = vld [vmem:[#allocation85_spill] sm:$0xff] }
 0x32c   :  { %2158 = vmatpush.msra.mxu3 %v1853_v33  ;;  %v1905_v33 = vmax.f32 %v1465_v23, 0.0  ;;  %v1904_v17 = vmax.f32 %v1463_v60, 0.0  ;;  %v4957_v60 = vld [vmem:[#allocation54_spill] sm:$0xff] }
 0x32d   :  { %2353 = vmatpush.msra.mxu1 %v2018_v36  ;;  %2133 = vmatpush.msra.mxu2 %v1842_v47  ;;  %v1910_v36 = vmax.f32 %v1478_v28, 0.0  ;;  %v1430_v47 = vadd.f32 %v4246_v25, %v4941_v14 }
 0x32e   :  { %2159 = vmatpush.msra.mxu3 %v1852_v57  ;;  %v4938_v57 = vld [vmem:[#allocation97_spill] sm:$0xff] }
 0x32f   :  { %2354 = vmatpush.msra.mxu1 %v2017_v21  ;;  %2134 = vmatpush.msra.mxu2 %v1841_v7  ;;  %v1906_v21 = vmax.f32 %v1468_v49, 0.0  ;;  %v1460_v8 = vadd.f32 %v4246_v25, %v4938_v57  ;;  %v1892_v7 = vmax.f32 %v1433_v0, 0.0  ;;  %v1593_v0 = vadd.f32 %v4246_v25, %v4960_v63 }
 0x330   :  { %2204 = vmatpush.msrb.mxu3 %v1915_v42  ;;  %v1893_v42 = vmax.f32 %v1435_v16, 0.0  ;;  %v1595_v16 = vadd.f32 %v4246_v25, %v4958_v62 }
 0x331   :  { %2355 = vmatpush.msra.mxu1 %v2016_v18  ;;  %2160 = vmatmul.f32.vlgmr.msra.gmra.mxu3 %v2033_v6  ;;  %v1455_v18 = vadd.f32 %v4246_v25, %v4942_v9  ;;  %v1903_v13 = vmax.f32 %v1460_v8, 0.0  ;;  %v4943_v6 = vld [vmem:[#allocation78_spill] sm:$0xff]  ;;  %v4959_v8 = vld [vmem:[#allocation52_spill] sm:$0xff] }
 0x332   :  { %2205 = vmatpush.msrb.mxu3 %v1914_v48  ;;  %2135 = vmatpush.msra.mxu2 %v1840_v58  ;;  %v1428_v19 = vadd.f32 %v4246_v25, %v4943_v6  ;;  %v4944_v48 = vld [vmem:[#allocation94_spill] sm:$0xff]  ;;  %v4946_v58 = vld [vmem:[#allocation75_spill] sm:$0xff]  ;;  %v1957_v9 = vmax.f32 %v1595_v16, 0.0 }
 0x333   :  { %2356 = vmatpush.msra.mxu1 %v2015_v5  ;;  %v1453_v1 = vadd.f32 %v4246_v25, %v4944_v48  ;;  %v1902_v5 = vmax.f32 %v1458_v59, 0.0  ;;  %v1425_v24 = vadd.f32 %v4246_v25, %v4946_v58  ;;  %v1901_v2 = vmax.f32 %v1455_v18, 0.0  ;;  %v4961_v59 = vld [vmem:[#allocation50_spill] sm:$0xff]  ;;  %v2035_v18 = vld [vmem:[%s4816_s1 + $0x38] sm:$0xff] }
 0x334   :  { %2206 = vmatpush.msrb.mxu3 %v1913_v30  ;;  %2136 = vmatpush.msra.mxu2 %v1839_v51  ;;  %v4945_v30 = vld [vmem:[#allocation93_spill] sm:$0xff]  ;;  %v4948_v51 = vld [vmem:[#allocation72_spill] sm:$0xff]  ;;  %v1890_v28 = vmax.f32 %v1428_v19, 0.0  ;;  %v4966_v58 = vld [vmem:[#allocation70_spill] sm:$0xff] }
 0x335   :  { %2357 = vmatpush.msra.mxu1 %v2014_v22  ;;  %v1610_v10 = vadd.f32 %v4246_v25, %v4945_v30  ;;  %v1891_v22 = vmax.f32 %v1430_v47, 0.0  ;;  %v1900_v11 = vmax.f32 %v1453_v1, 0.0  ;;  %v1889_v34 = vmax.f32 %v1425_v24, 0.0  ;;  %v4962_v47 = vld [vmem:[#allocation76_spill] sm:$0xff] }
 0x336   :  { %2207 = vmatpush.msrb.mxu3 %v1912_v56  ;;  %2137 = vmatpush.msra.mxu2 %v1838_v55  ;;  %v4947_v56 = vld [vmem:[#allocation92_spill] sm:$0xff]  ;;  %v4949_v55 = vld [vmem:[#allocation91_spill] sm:$0xff]  ;;  %v1956_v1 = vmax.f32 %v1593_v0, 0.0  ;;  %v1585_v24 = vadd.f32 %v4246_v25, %v4966_v58 }
 0x337   :  { %2358 = vmatpush.msra.mxu1 %v2013_v46  ;;  %v1608_v15 = vadd.f32 %v4246_v25, %v4947_v56  ;;  %v1423_v46 = vadd.f32 %v4246_v25, %v4948_v51  ;;  %v1605_v38 = vadd.f32 %v4246_v25, %v4949_v55  ;;  %v4968_v51 = vld [vmem:[#allocation67_spill] sm:$0xff] }
 0x338   :  { %2208 = vmatpush.msrb.mxu3 %v1911_v32  ;;  %2138 = vmatpush.msra.mxu2 %v1837_v61  ;;  %v4950_v32 = vld [vmem:[#allocation69_spill] sm:$0xff] }
 0x339   :  { %2359 = vmatpush.msra.mxu1 %v2012_v37  ;;  %v1963_v37 = vmax.f32 %v1610_v10, 0.0  ;;  %v1420_v61 = vadd.f32 %v4246_v25, %v4950_v32  ;;  %v1888_v12 = vmax.f32 %v1423_v46, 0.0  ;;  %v1961_v3 = vmax.f32 %v1605_v38, 0.0 }
 0x33a   :  { %2209 = vmatpush.msrb.mxu3 %v1910_v36  ;;  %2139 = vmatpush.msra.mxu2 %v1836_v43  ;;  %v1603_v36 = vadd.f32 %v4246_v25, %v4951_v52  ;;  %v1962_v43 = vmax.f32 %v1608_v15, 0.0  ;;  %v1583_v46 = vadd.f32 %v4246_v25, %v4968_v51 }
 0x33b   :  { %2140 = vmatmul.f32.vlgmr.msra.gmra.mxu2 %v2032_v45 }
 0x33c   :  { %2184 = vmatpush.msrb.mxu2 %v1899_v35  ;;  %2210 = vmatpush.msrb.mxu3 %v1909_v50  ;;  %v1418_v35 = vadd.f32 %v4246_v25, %v4952_v31  ;;  %v4953_v50 = vld [vmem:[#allocation88_spill] sm:$0xff]  ;;  %v1960_v23 = vmax.f32 %v1603_v36, 0.0 }
 0x33d   :  { %v1600_v45 = vadd.f32 %v4246_v25, %v4953_v50 }
 0x33e   :  { %2185 = vmatpush.msrb.mxu2 %v1898_v53  ;;  %2211 = vmatpush.msrb.mxu3 %v1908_v41  ;;  %v4954_v53 = vld [vmem:[#allocation63_spill] sm:$0xff]  ;;  %v1887_v41 = vmax.f32 %v1420_v61, 0.0  ;;  %v1953_v61 = vmax.f32 %v1585_v24, 0.0 }
 0x33f   :  { %v1415_v49 = vadd.f32 %v4246_v25, %v4954_v53 }
 0x340   :  { %2186 = vmatpush.msrb.mxu2 %v1897_v40  ;;  %2212 = vmatpush.msrb.mxu3 %v1907_v26  ;;  %v1598_v40 = vadd.f32 %v4246_v25, %v4955_v54  ;;  %v4956_v26 = vld [vmem:[#allocation60_spill] sm:$0xff] }
 0x341   :  { %v1413_v20 = vadd.f32 %v4246_v25, %v4956_v26  ;;  %v1885_v57 = vmax.f32 %v1415_v49, 0.0 }
 0x342   :  { %2187 = vmatpush.msrb.mxu2 %v1896_v44  ;;  %2213 = vmatpush.msrb.mxu3 %v1906_v21  ;;  %v1886_v44 = vmax.f32 %v1418_v35, 0.0  ;;  %v1570_v21 = vadd.f32 %v4246_v25, %v4957_v60  ;;  %v2040_v35 = vld [vmem:[%s4816_s1 + $0x60] sm:$0xff] }
 0x343   :  { %v1884_v27 = vmax.f32 %v1413_v20, 0.0  ;;  %2300 = vmatmul.f32.vlgmr.msrb.gmra.mxu1 %v2040_v35 }
 0x344   :  { %2188 = vmatpush.msrb.mxu2 %v1895_v4  ;;  %2214 = vmatpush.msrb.mxu3 %v1905_v33  ;;  %v1959_v4 = vmax.f32 %v1600_v45, 0.0  ;;  %v1568_v33 = vadd.f32 %v4246_v25, %v4959_v8  ;;  %v1947_v14 = vmax.f32 %v1570_v21, 0.0  ;;  %v4978_v21 = vld [vmem:[#allocation34_spill] sm:$0xff] }
 0x346   :  { %2189 = vmatpush.msrb.mxu2 %v1894_v29  ;;  %2215 = vmatpush.msrb.mxu3 %v1904_v17  ;;  %v1958_v29 = vmax.f32 %v1598_v40, 0.0  ;;  %v1565_v17 = vadd.f32 %v4246_v25, %v4961_v59  ;;  %v1946_v19 = vmax.f32 %v1568_v33, 0.0  ;;  %v4980_v33 = vld [vmem:[#allocation32_spill] sm:$0xff] }
 0x348   :  { %2190 = vmatpush.msrb.mxu2 %v1893_v42  ;;  %2216 = vmatpush.msrb.mxu3 %v1903_v13  ;;  %v1590_v42 = vadd.f32 %v4246_v25, %v4962_v47  ;;  %v4963_v13 = vld [vmem:[#allocation48_spill] sm:$0xff]  ;;  %v1945_v10 = vmax.f32 %v1565_v17, 0.0  ;;  %v4982_v47 = vld [vmem:[#allocation30_spill] sm:$0xff] }
 0x349   :  { %v1563_v6 = vadd.f32 %v4246_v25, %v4963_v13 }
 0x34a   :  { %2191 = vmatpush.msrb.mxu2 %v1892_v7  ;;  %2217 = vmatpush.msrb.mxu3 %v1902_v5  ;;  %v4964_v7 = vld [vmem:[#allocation73_spill] sm:$0xff]  ;;  %v4965_v5 = vld [vmem:[#allocation46_spill] sm:$0xff] }
 0x34b   :  { %v1588_v48 = vadd.f32 %v4246_v25, %v4964_v7  ;;  %v1560_v30 = vadd.f32 %v4246_v25, %v4965_v5  ;;  %v1944_v15 = vmax.f32 %v1563_v6, 0.0 }
 0x34c   :  { %2192 = vmatpush.msrb.mxu2 %v1891_v22  ;;  %2218 = vmatpush.msrb.mxu3 %v1901_v2  ;;  %v1955_v22 = vmax.f32 %v1590_v42, 0.0  ;;  %v4967_v2 = vld [vmem:[#allocation44_spill] sm:$0xff] }
 0x34d   :  { %v1558_v56 = vadd.f32 %v4246_v25, %v4967_v2  ;;  %v1943_v38 = vmax.f32 %v1560_v30, 0.0 }
 0x34e   :  { %2193 = vmatpush.msrb.mxu2 %v1890_v28  ;;  %2219 = vmatpush.msrb.mxu3 %v1900_v11  ;;  %v1954_v28 = vmax.f32 %v1588_v48, 0.0  ;;  %v4969_v11 = vld [vmem:[#allocation42_spill] sm:$0xff] }
 0x34f   :  { %2220 = vmatmul.f32.vlgmr.msrb.gmra.mxu3 %v2036_v39  ;;  %v1555_v55 = vadd.f32 %v4246_v25, %v4969_v11  ;;  %v4970_v39 = vld [vmem:[#allocation64_spill] sm:$0xff]  ;;  %v1942_v36 = vmax.f32 %v1558_v56, 0.0  ;;  %v1952_v25 = vmax.f32 %v1583_v46, 0.0 }
 0x350   :  { %2264 = vmatpush.msra.mxu3 %v1963_v37  ;;  %2194 = vmatpush.msrb.mxu2 %v1889_v34  ;;  %v4643_v37 = vld [vmem:[%s4814_s3] ss:$0 sm:$0xff]  ;;  %v4971_v34 = vld [vmem:[#allocation40_spill] sm:$0xff] }
 0x351   :  { %v1580_v32 = vadd.f32 %v4643_v37, %v4970_v39  ;;  %v1553_v52 = vadd.f32 %v4643_v37, %v4971_v34  ;;  %v1941_v45 = vmax.f32 %v1555_v55, 0.0  ;;  %v1545_v62 = vadd.f32 %v4643_v37, %v4978_v21  ;;  %v4990_v55 = vld [vmem:[#allocation71_spill] sm:$0xff] }
 0x352   :  { %2265 = vmatpush.msra.mxu3 %v1962_v43  ;;  %2195 = vmatpush.msrb.mxu2 %v1888_v12  ;;  %v4972_v43 = vld [vmem:[#allocation61_spill] sm:$0xff]  ;;  %v4973_v12 = vld [vmem:[#allocation38_spill] sm:$0xff]  ;;  %v1543_v63 = vadd.f32 %v4643_v37, %v4980_v33  ;;  %v1540_v42 = vadd.f32 %v4643_v37, %v4982_v47 }
 0x353   :  { %v1578_v31 = vadd.f32 %v4643_v37, %v4972_v43  ;;  %v1550_v50 = vadd.f32 %v4643_v37, %v4973_v12  ;;  %v1951_v49 = vmax.f32 %v1580_v32, 0.0  ;;  %v1940_v40 = vmax.f32 %v1553_v52, 0.0  ;;  %v4992_v52 = vld [vmem:[#allocation68_spill] sm:$0xff] }
 0x354   :  { %2266 = vmatpush.msra.mxu3 %v1961_v3  ;;  %2196 = vmatpush.msrb.mxu2 %v1887_v41  ;;  %v4974_v3 = vld [vmem:[#allocation58_spill] sm:$0xff]  ;;  %v4975_v41 = vld [vmem:[#allocation36_spill] sm:$0xff]  ;;  %v1936_v48 = vmax.f32 %v1543_v63, 0.0  ;;  %v1935_v24 = vmax.f32 %v1540_v42, 0.0  ;;  %v5000_v63 = vld [vmem:[#allocation57_spill] sm:$0xff] }
 0x355   :  { %v1575_v53 = vadd.f32 %v4643_v37, %v4974_v3  ;;  %v1548_v54 = vadd.f32 %v4643_v37, %v4975_v41  ;;  %v1950_v20 = vmax.f32 %v1578_v31, 0.0  ;;  %v1939_v16 = vmax.f32 %v1550_v50, 0.0  ;;  %v4994_v50 = vld [vmem:[#allocation65_spill] sm:$0xff] }
 0x356   :  { %2267 = vmatpush.msra.mxu3 %v1960_v23  ;;  %2197 = vmatpush.msrb.mxu2 %v1886_v44  ;;  %v4976_v23 = vld [vmem:[#allocation56_spill] sm:$0xff]  ;;  %v4977_v44 = vld [vmem:[#allocation89_spill] sm:$0xff] }
 0x357   :  { %v1573_v26 = vadd.f32 %v4643_v37, %v4976_v23  ;;  %v1730_v60 = vadd.f32 %v4643_v37, %v4977_v44  ;;  %v1938_v0 = vmax.f32 %v1548_v54, 0.0  ;;  %v4995_v41 = vld [vmem:[#allocation41_spill] sm:$0xff]  ;;  %v4996_v23 = vld [vmem:[#allocation62_spill] sm:$0xff]  ;;  %v4997_v44 = vld [vmem:[#allocation39_spill] sm:$0xff] }
 0x358   :  { %2268 = vmatpush.msra.mxu3 %v1959_v4  ;;  %2198 = vmatpush.msrb.mxu2 %v1885_v57  ;;  %v1949_v4 = vmax.f32 %v1575_v53, 0.0  ;;  %v4979_v57 = vld [vmem:[#allocation86_spill] sm:$0xff]  ;;  %v2038_v53 = vld [vmem:[%s4816_s1 + $0x50] sm:$0xff]  ;;  %v1683_v54 = vadd.f32 %v4643_v37, %v4995_v41 }
 0x359   :  { %v1728_v8 = vadd.f32 %v4643_v37, %v4979_v57  ;;  %v2011_v17 = vmax.f32 %v1730_v60, 0.0  ;;  %v1680_v60 = vadd.f32 %v4643_v37, %v4997_v44  ;;  %v4999_v57 = vld [vmem:[#allocation37_spill] sm:$0xff] }
 0x35a   :  { %2269 = vmatpush.msra.mxu3 %v1958_v29  ;;  %2199 = vmatpush.msrb.mxu2 %v1884_v27  ;;  %v1948_v29 = vmax.f32 %v1573_v26, 0.0  ;;  %v4981_v27 = vld [vmem:[#allocation83_spill] sm:$0xff]  ;;  %v1708_v26 = vadd.f32 %v4643_v37, %v4996_v23  ;;  %v1992_v33 = vmax.f32 %v1683_v54, 0.0  ;;  %v3290_v23 = vld [vmem:[%s4817_s4 + $0x38] sm:$0xff] }
 0x35b   :  { %2200 = vmatmul.f32.vlgmr.msrb.gmra.mxu2 %v2035_v18  ;;  %v1725_v59 = vadd.f32 %v4643_v37, %v4981_v27  ;;  %v4983_v18 = vld [vmem:[#allocation80_spill] sm:$0xff]  ;;  %v2010_v6 = vmax.f32 %v1728_v8, 0.0  ;;  %v1678_v8 = vadd.f32 %v4643_v37, %v4999_v57  ;;  %v5001_v27 = vld [vmem:[#allocation35_spill] sm:$0xff]  ;;  %v3286_v44 = vld [vmem:[%s4817_s4 + $0x18] sm:$0xff] }
 0x35c   :  { %2244 = vmatpush.msra.mxu2 %v1947_v14  ;;  %2270 = vmatpush.msra.mxu3 %v1957_v9  ;;  %v2039_v14 = vld [vmem:[%s4816_s1 + $0x58] sm:$0xff]  ;;  %v1937_v9 = vmax.f32 %v1545_v62, 0.0  ;;  %v1723_v13 = vadd.f32 %v4643_v37, %v4983_v18  ;;  %v4998_v62 = vld [vmem:[#allocation59_spill] sm:$0xff] }
 0x35d   :  { %v2009_v30 = vmax.f32 %v1725_v59, 0.0  ;;  %v1675_v59 = vadd.f32 %v4643_v37, %v5001_v27 }
 0x35e   :  { %2245 = vmatpush.msra.mxu2 %v1946_v19  ;;  %2271 = vmatpush.msra.mxu3 %v1956_v1  ;;  %v4984_v19 = vld [vmem:[#allocation28_spill] sm:$0xff]  ;;  %v4985_v1 = vld [vmem:[#allocation77_spill] sm:$0xff]  ;;  %v2008_v56 = vmax.f32 %v1723_v13, 0.0  ;;  %v1990_v13 = vmax.f32 %v1678_v8, 0.0 }
 0x35f   :  { %v1538_v7 = vadd.f32 %v4643_v37, %v4984_v19  ;;  %v1720_v5 = vadd.f32 %v4643_v37, %v4985_v1 }
 0x360   :  { %2246 = vmatpush.msra.mxu2 %v1945_v10  ;;  %2272 = vmatpush.msra.mxu3 %v1955_v22  ;;  %v4986_v10 = vld [vmem:[#allocation26_spill] sm:$0xff] }
 0x361   :  { %v1535_v58 = vadd.f32 %v4643_v37, %v4986_v10  ;;  %v4987_v22 = vld [vmem:[#allocation74_spill] sm:$0xff]  ;;  %v1934_v46 = vmax.f32 %v1538_v7, 0.0  ;;  %v2007_v39 = vmax.f32 %v1720_v5, 0.0  ;;  %v1989_v5 = vmax.f32 %v1675_v59, 0.0 }
 0x362   :  { %2247 = vmatpush.msra.mxu2 %v1944_v15  ;;  %2273 = vmatpush.msra.mxu3 %v1954_v28  ;;  %v1718_v2 = vadd.f32 %v4643_v37, %v4987_v22  ;;  %v4988_v15 = vld [vmem:[#allocation24_spill] sm:$0xff]  ;;  %v4989_v28 = vld [vmem:[#allocation47_spill] sm:$0xff]  ;;  %v3283_v59 = vld [vmem:[%s4817_s4] sm:$0xff] }
 0x363   :  { %v1533_v51 = vadd.f32 %v4643_v37, %v4988_v15  ;;  %v1690_v11 = vadd.f32 %v4643_v37, %v4989_v28  ;;  %v1933_v32 = vmax.f32 %v1535_v58, 0.0 }
 0x364   :  { %2248 = vmatpush.msra.mxu2 %v1943_v38  ;;  %2274 = vmatpush.msra.mxu3 %v1953_v61  ;;  %v1715_v38 = vadd.f32 %v4643_v37, %v4990_v55  ;;  %v4991_v61 = vld [vmem:[#allocation45_spill] sm:$0xff]  ;;  %v2006_v43 = vmax.f32 %v1718_v2, 0.0 }
 0x365   :  { %v1688_v34 = vadd.f32 %v4643_v37, %v4991_v61  ;;  %v1932_v31 = vmax.f32 %v1533_v51, 0.0  ;;  %v1995_v12 = vmax.f32 %v1690_v11, 0.0 }
 0x366   :  { %2249 = vmatpush.msra.mxu2 %v1942_v36  ;;  %2275 = vmatpush.msra.mxu3 %v1952_v25  ;;  %v1713_v36 = vadd.f32 %v4643_v37, %v4992_v52  ;;  %v4993_v25 = vld [vmem:[#allocation43_spill] sm:$0xff]  ;;  %v2005_v3 = vmax.f32 %v1715_v38, 0.0  ;;  %v5010_v38 = vld [vmem:[#allocation25_spill] sm:$0xff] }
 0x367   :  { %v1685_v35 = vadd.f32 %v4643_v37, %v4993_v25  ;;  %v5011_v52 = vld [vmem:[#allocation23_spill] sm:$0xff] }
 0x368   :  { %2250 = vmatpush.msra.mxu2 %v1941_v45  ;;  %2276 = vmatpush.msra.mxu3 %v1951_v49  ;;  %v1710_v45 = vadd.f32 %v4643_v37, %v4994_v50  ;;  %v2043_v49 = vld [vmem:[%s4816_s1 + $0x78] sm:$0xff] }
 0x369   :  { %2360 = vmatmul.f32.vlgmr.msra.gmra.mxu1 %v2043_v49  ;;  %v1993_v21 = vmax.f32 %v1685_v35, 0.0 }
 0x36a   :  { %2251 = vmatpush.msra.mxu2 %v1940_v40  ;;  %2277 = vmatpush.msra.mxu3 %v1950_v20  ;;  %v1994_v40 = vmax.f32 %v1688_v34, 0.0  ;;  %v2004_v20 = vmax.f32 %v1713_v36, 0.0  ;;  %v2042_v34 = vld [vmem:[%s4816_s1 + $0x70] sm:$0xff]  ;;  %v1660_v36 = vadd.f32 %v4643_v37, %v5011_v52 }
 0x36c   :  { %2252 = vmatpush.msra.mxu2 %v1939_v16  ;;  %2278 = vmatpush.msra.mxu3 %v1949_v4  ;;  %v1705_v16 = vadd.f32 %v4643_v37, %v4998_v62  ;;  %v2003_v4 = vmax.f32 %v1710_v45, 0.0  ;;  %v1983_v45 = vmax.f32 %v1660_v36, 0.0 }
 0x36e   :  { %2253 = vmatpush.msra.mxu2 %v1938_v0  ;;  %2279 = vmatpush.msra.mxu3 %v1948_v29  ;;  %v1703_v0 = vadd.f32 %v4643_v37, %v5000_v63  ;;  %v2002_v29 = vmax.f32 %v1708_v26, 0.0  ;;  %v2001_v42 = vmax.f32 %v1705_v16, 0.0  ;;  %v3288_v26 = vld [vmem:[%s4817_s4 + $0x28] sm:$0xff] }
 0x36f   :  { %2280 = vmatmul.f32.vlgmr.msra.gmra.mxu3 %v2039_v14  ;;  %v5002_v14 = vld [vmem:[#allocation55_spill] sm:$0xff] }
 0x370   :  { %2324 = vmatpush.msrb.mxu3 %v2011_v17  ;;  %2254 = vmatpush.msra.mxu2 %v1937_v9  ;;  %v1991_v17 = vmax.f32 %v1680_v60, 0.0  ;;  %v1700_v47 = vadd.f32 %v4643_v37, %v5002_v14  ;;  %v5003_v9 = vld [vmem:[#allocation33_spill] sm:$0xff]  ;;  %v2000_v7 = vmax.f32 %v1703_v0, 0.0  ;;  %v3285_v60 = vld [vmem:[%s4817_s4 + $0x10] sm:$0xff]  ;;  %v3284_v0 = vld [vmem:[%s4817_s4 + $0x8] sm:$0xff] }
 0x371   :  { %v1673_v18 = vadd.f32 %v4643_v37, %v5003_v9 }
 0x372   :  { %2325 = vmatpush.msrb.mxu3 %v2010_v6  ;;  %2255 = vmatpush.msra.mxu2 %v1936_v48  ;;  %v5004_v6 = vld [vmem:[#allocation53_spill] sm:$0xff]  ;;  %v5005_v48 = vld [vmem:[#allocation31_spill] sm:$0xff]  ;;  %v1999_v58 = vmax.f32 %v1700_v47, 0.0 }
 0x373   :  { %v1698_v19 = vadd.f32 %v4643_v37, %v5004_v6  ;;  %v1670_v1 = vadd.f32 %v4643_v37, %v5005_v48  ;;  %v1988_v2 = vmax.f32 %v1673_v18, 0.0  ;;  %v3298_v47 = vld [vmem:[%s4819_s6 + $0x38] sm:$0xff]  ;;  %v3297_v18 = vld [vmem:[%s4819_s6 + $0x30] sm:$0xff] }
 0x374   :  { %2326 = vmatpush.msrb.mxu3 %v2009_v30  ;;  %2256 = vmatpush.msra.mxu2 %v1935_v24  ;;  %v5006_v30 = vld [vmem:[#allocation51_spill] sm:$0xff]  ;;  %v5007_v24 = vld [vmem:[#allocation29_spill] sm:$0xff] }
 0x375   :  { %v1695_v10 = vadd.f32 %v4643_v37, %v5006_v30  ;;  %v1668_v22 = vadd.f32 %v4643_v37, %v5007_v24  ;;  %v1998_v51 = vmax.f32 %v1698_v19, 0.0  ;;  %v1987_v11 = vmax.f32 %v1670_v1, 0.0  ;;  %v3296_v19 = vld [vmem:[%s4819_s6 + $0x28] sm:$0xff]  ;;  %v3295_v1 = vld [vmem:[%s4819_s6 + $0x20] sm:$0xff] }
 0x376   :  { %2327 = vmatpush.msrb.mxu3 %v2008_v56  ;;  %2257 = vmatpush.msra.mxu2 %v1934_v46  ;;  %v5008_v56 = vld [vmem:[#allocation49_spill] sm:$0xff]  ;;  %v5009_v46 = vld [vmem:[#allocation27_spill] sm:$0xff] }
 0x377   :  { %v1693_v15 = vadd.f32 %v4643_v37, %v5008_v56  ;;  %v1665_v28 = vadd.f32 %v4643_v37, %v5009_v46  ;;  %v1997_v55 = vmax.f32 %v1695_v10, 0.0  ;;  %v2081_v62 = vpop.f32.mrf.mxu2  ;;  %v3293_v56 = vld [vmem:[%s4819_s6 + $0x10] sm:$0xff] }
 0x378   :  { %2328 = vmatpush.msrb.mxu3 %v2007_v39  ;;  %2258 = vmatpush.msra.mxu2 %v1933_v32  ;;  %v1663_v39 = vadd.f32 %v4643_v37, %v5010_v38  ;;  %v1986_v32 = vmax.f32 %v1668_v22, 0.0 }
 0x379   :  { %v1996_v61 = vmax.f32 %v1693_v15, 0.0 }
 0x37a   :  { %2329 = vmatpush.msrb.mxu3 %v2006_v43  ;;  %2259 = vmatpush.msra.mxu2 %v1932_v31  ;;  %v1985_v43 = vmax.f32 %v1665_v28, 0.0  ;;  %v5012_v31 = vld [vmem:[#allocation22_spill] sm:$0xff]  ;;  %v1984_v35 = vmax.f32 %v1663_v39, 0.0 }
 0x37b   :  { %2260 = vmatmul.f32.vlgmr.msra.gmra.mxu2 %v2038_v53  ;;  %v1658_v25 = vadd.f32 %v4643_v37, %v5012_v31 }
 0x37c   :  { %2304 = vmatpush.msrb.mxu2 %v1995_v12  ;;  %2330 = vmatpush.msrb.mxu3 %v2005_v3  ;;  %v5013_v12 = vld [vmem:[#allocation21_spill] sm:$0xff]  ;;  %v5014_v3 = vld [vmem:[#allocation20_spill] sm:$0xff] }
 0x37d   :  { %v1655_v50 = vadd.f32 %v4643_v37, %v5013_v12  ;;  %v1653_v53 = vadd.f32 %v4643_v37, %v5014_v3  ;;  %v1982_v49 = vmax.f32 %v1658_v25, 0.0  ;;  %v3289_v37 = vld [vmem:[%s4817_s4 + $0x30] sm:$0xff] }
 0x37e   :  { %2305 = vmatpush.msrb.mxu2 %v1994_v40  ;;  %2331 = vmatpush.msrb.mxu3 %v2004_v20  ;;  %v2041_v40 = vld [vmem:[%s4816_s1 + $0x68] sm:$0xff]  ;;  %v3287_v20 = vld [vmem:[%s4817_s4 + $0x20] sm:$0xff] }
 0x37f   :  { %v1981_v41 = vmax.f32 %v1655_v50, 0.0  ;;  %v1980_v54 = vmax.f32 %v1653_v53, 0.0 }
 0x380   :  { %2306 = vmatpush.msrb.mxu2 %v1993_v21  ;;  %2332 = vmatpush.msrb.mxu3 %v2003_v4  ;;  %v2061_v21 = vpop.f32.mrf.mxu1  ;;  %v2101_v4 = vpop.f32.mrf.mxu3 }
 0x381   :  { %v2082_v16 = vadd.f32 %v2081_v62, %v2061_v21 }
 0x382   :  { %2307 = vmatpush.msrb.mxu2 %v1992_v33  ;;  %2333 = vmatpush.msrb.mxu3 %v2002_v29 }
 0x383   :  { %v2102_v57 = vadd.f32 %v2101_v4, %v2082_v16 }
 0x384   :  { %2308 = vmatpush.msrb.mxu2 %v1991_v17  ;;  %2334 = vmatpush.msrb.mxu3 %v2001_v42 }
 0x386   :  { %2309 = vmatpush.msrb.mxu2 %v1990_v13  ;;  %2335 = vmatpush.msrb.mxu3 %v2000_v7 }
 0x388   :  { %2310 = vmatpush.msrb.mxu2 %v1989_v5  ;;  %2336 = vmatpush.msrb.mxu3 %v1999_v58  ;;  %v2121_v8 = vpop.f32.mrf.mxu1  ;;  %v3294_v58 = vld [vmem:[%s4819_s6 + $0x18] sm:$0xff] }
 0x389   :  { %v2122_v63 = vadd.f32 %v2121_v8, %v2102_v57 }
 0x38a   :  { %2311 = vmatpush.msrb.mxu2 %v1988_v2  ;;  %2337 = vmatpush.msrb.mxu3 %v1998_v51 }
 0x38c   :  { %2312 = vmatpush.msrb.mxu2 %v1987_v11  ;;  %2338 = vmatpush.msrb.mxu3 %v1997_v55 }
 0x38e   :  { %2313 = vmatpush.msrb.mxu2 %v1986_v32  ;;  %2339 = vmatpush.msrb.mxu3 %v1996_v61  ;;  %v3292_v32 = vld [vmem:[%s4819_s6 + $0x8] sm:$0xff]  ;;  %v3291_v61 = vld [vmem:[%s4819_s6] sm:$0xff] }
 0x38f   :  { %2340 = vmatmul.f32.vlgmr.msrb.gmra.mxu3 %v2042_v34  ;;  %v3324_v34 = vld [vmem:[%s4818_s5] ss:$0 sm:$0xff] }
 0x390   :  { %2314 = vmatpush.msrb.mxu2 %v1985_v43  ;;  %v2181_v14 = vpop.f32.mrf.mxu1  ;;  %2517 = vmatpush.bf16.msra.mxu3 %v3298_v47 }
 0x392   :  { %2315 = vmatpush.msrb.mxu2 %v1984_v35  ;;  %v3325_v35 = vld [vmem:[%s4820_s7] ss:$0 sm:$0xff] }
 0x394   :  { %2316 = vmatpush.msrb.mxu2 %v1983_v45  ;;  %2518 = vmatpush.bf16.msra.mxu3 %v3297_v18 }
 0x396   :  { %2317 = vmatpush.msrb.mxu2 %v1982_v49 }
 0x398   :  { %2318 = vmatpush.msrb.mxu2 %v1981_v41  ;;  %v2241_v48 = vpop.f32.mrf.mxu1  ;;  %2519 = vmatpush.bf16.msra.mxu3 %v3296_v19 }
 0x39a   :  { %2319 = vmatpush.msrb.mxu2 %v1980_v54 }
 0x39b   :  { %2320 = vmatmul.f32.vlgmr.msrb.gmra.mxu2 %v2041_v40 }
 0x39c   :  { %2433 = vmatpush.bf16.msra.mxu2 %v3290_v23  ;;  %2520 = vmatpush.bf16.msra.mxu3 %v3295_v1 }
 0x3a0   :  { %2434 = vmatpush.bf16.msra.mxu2 %v3289_v37  ;;  %2521 = vmatpush.bf16.msra.mxu3 %v3294_v58 }
 0x3a4   :  { %2435 = vmatpush.bf16.msra.mxu2 %v3288_v26  ;;  %2522 = vmatpush.bf16.msra.mxu3 %v3293_v56 }
 0x3a8   :  { %2436 = vmatpush.bf16.msra.mxu2 %v3287_v20  ;;  %2523 = vmatpush.bf16.msra.mxu3 %v3292_v32 }
 0x3ac   :  { %2437 = vmatpush.bf16.msra.mxu2 %v3286_v44  ;;  %2524 = vmatpush.bf16.msra.mxu3 %v3291_v61 }
 0x3b0   :  { %2438 = vmatpush.bf16.msra.mxu2 %v3285_v60 }
 0x3b4   :  { %2439 = vmatpush.bf16.msra.mxu2 %v3284_v0  ;;  %v2161_v27 = vpop.f32.mrf.mxu3 }
 0x3b8   :  { %2440 = vmatpush.bf16.msra.mxu2 %v3283_v59 }
 0x3be   :  { %v2141_v33 = vpop.f32.mrf.mxu2 }
 0x3bf   :  { %v2142_v29 = vadd.f32 %v2141_v33, %v2122_v63 }
 0x3c0   :  { %v2301_v22 = vpop.f32.mrf.mxu1 }
 0x3c1   :  { %v2162_v17 = vadd.f32 %v2161_v27, %v2142_v29 }
 0x3c3   :  { %v2182_v9 = vadd.f32 %v2181_v14, %v2162_v17 }
 0x3d2   :  { %v2221_v6 = vpop.f32.mrf.mxu3 }
 0x3de   :  { %v2201_v42 = vpop.f32.mrf.mxu2 }
 0x3df   :  { %v2202_v13 = vadd.f32 %v2201_v42, %v2182_v9 }
 0x3e1   :  { %v2222_v7 = vadd.f32 %v2221_v6, %v2202_v13 }
 0x3e3   :  { %v2242_v30 = vadd.f32 %v2241_v48, %v2222_v7 }
 0x3e6   :  { %v2361_v11 = vpop.f32.mrf.mxu1 }
 0x3f2   :  { %v2281_v24 = vpop.f32.mrf.mxu3 }
 0x3fe   :  { %v2261_v5 = vpop.f32.mrf.mxu2 }
 0x3ff   :  { %v2262_v10 = vadd.f32 %v2261_v5, %v2242_v30 }
 0x401   :  { %v2282_v2 = vadd.f32 %v2281_v24, %v2262_v10 }
 0x403   :  { %v2302_v15 = vadd.f32 %v2301_v22, %v2282_v2 }
 0x412   :  { %v2341_v46 = vpop.f32.mrf.mxu3 }
 0x41e   :  { %v2321_v51 = vpop.f32.mrf.mxu2 }
 0x41f   :  { %v2322_v28 = vadd.f32 %v2321_v51, %v2302_v15 }
 0x421   :  { %v2342_v55 = vadd.f32 %v2341_v46, %v2322_v28 }
 0x423   :  { %v2362_v38 = vadd.f32 %v2361_v11, %v2342_v55 }
 0x425   :  { %v2364_v39 = vpack.c.bf16 %v2362_v38, %v2362_v38 }
 0x427   :  { %2441 = vmatmul.bf16.vlgmr.msra.gmra.mxu2 %v2364_v39 }
 0x4aa   :  { %v2442_v52 = vpop.f32.mrf.mxu2 }
 0x4ab   :  { %v2443_v36 = vadd.f32 %v3324_v34, %v2442_v52 }
 0x4ad   :  { %v2446_v43 = vmax.f32 %v2443_v36, 0.0 }
 0x4af   :  { %2447 = vst [vmem:[%s4821_s9] sm:$0xff] %v2446_v43  ;;  %v2448_v31 = vpack.c.bf16 %v2446_v43, %v2446_v43 }
 0x4b1   :  { %2525 = vmatmul.bf16.vlgmr.msra.gmra.mxu3 %v2448_v31 }
 0x4b2   :  { %v2444_v25 = vpop.f32.mrf.mxu2 }
 0x534   :  { %v2526_v12 = vpop.f32.mrf.mxu3 }
 0x535   :  { %v2527_v50 = vadd.f32 %v3325_v35, %v2526_v12 }
 0x537   :  { %2530 = vst [vmem:[%s4822_s8] sm:$0xff] %v2527_v50 }
 0x53c   :  { %v2528_v45 = vpop.f32.mrf.mxu3 }

</bundles_post_ra>
